<compile_context>
chip_gen: v5e
topology: v5e:2x2
jax: 0.10.0
libtpu: 0.0.40
codegen_flags: <defaults>
</compile_context>

<pallas_src>
import jax
import jax.numpy as jnp
from jax.experimental import pallas as pl
from jax.experimental.pallas import tpu as pltpu

D_MODEL = 128          # hidden_size default of GlobalEncoder
N_HEADS = 4
HEAD_DIM = D_MODEL // N_HEADS
D_FF = 2048            # nn.TransformerEncoderLayer default dim_feedforward
LN_EPS = 1e-5


def _layer_norm(x, w, b):
    mean = jnp.mean(x, axis=-1, keepdims=True)
    var = jnp.mean((x - mean) ** 2, axis=-1, keepdims=True)
    inv = jax.lax.rsqrt(var + LN_EPS)
    return (x - mean) * inv * w + b


def encoder_layer_kernel(
    x_ref,                                             # (Bt, S, D) f32
    wqkv_ref, wo_ref, w1_ref, w2_ref,                  # bf16 weights
    bqkv_ref, bo_ref, b1_ref, b2_ref,                  # f32 biases
    ln1w_ref, ln1b_ref, ln2w_ref, ln2b_ref,            # f32 LN params
    o_ref,                                             # (Bt, S, D) f32
):
    Bt, S, D = x_ref.shape
    rows = Bt * S
    bf = jnp.bfloat16

    # Flatten batch into the row dimension for the projection / FFN matmuls.
    x = x_ref[...].reshape(rows, D)                    # f32
    xb = x.astype(bf)

    # ---- fused QKV projection: one fat N=384 bf16 MXU dot, f32 accumulation.
    # The 1/sqrt(HEAD_DIM) attention scale is pre-folded into the Q third of
    # wqkv/bqkv (wrapper).  Slices at 0/128/256 are 128-lane aligned (free).
    qkv = jnp.dot(xb, wqkv_ref[...],
                  preferred_element_type=jnp.float32) + bqkv_ref[...]
    q3 = qkv[:, 0 * D:1 * D].astype(bf).reshape(Bt, S, D)   # bf16 cast once
    k3 = qkv[:, 1 * D:2 * D].astype(bf).reshape(Bt, S, D)
    v3 = qkv[:, 2 * D:3 * D].astype(bf).reshape(Bt, S, D)

    # ---- multi-head self-attention (static 4-way head unroll, Bt-batched
    # einsums with a leading batch dim).  Head contexts are lane-concatenated
    # and hit wo with a single K=128 dot.
    # TODO(synk): batch all heads into one dot_general pair (needs an in-kernel
    # (0,2,1,3) transpose / einshape whose Mosaic lowering is unverified here),
    # and flash-style KV tiling + D_FF tiling for very large S / row tiles so
    # the (Bt,S,S) scores and (rows,D_FF) hidden stay inside v7x's 64 MiB VMEM.
    ctx_heads = []
    for h in range(N_HEADS):
        lo = h * HEAD_DIM
        qh = q3[:, :, lo:lo + HEAD_DIM]                # (Bt, S, hd) bf16
        kh = k3[:, :, lo:lo + HEAD_DIM]
        vh = v3[:, :, lo:lo + HEAD_DIM]
        s = jnp.einsum('bqd,bkd->bqk', qh, kh,
                       preferred_element_type=jnp.float32)       # (Bt, S, S)
        s = s - jnp.max(s, axis=-1, keepdims=True)
        p = jnp.exp(s)
        p = p * pl.reciprocal(jnp.sum(p, axis=-1, keepdims=True), approx=True)
        ctx_heads.append(
            jnp.einsum('bqk,bkd->bqd', p.astype(bf), vh,
                       preferred_element_type=jnp.float32))      # (Bt, S, hd)
    ctx = jnp.concatenate(ctx_heads, axis=-1).reshape(rows, D)   # (rows, D)
    attn = jnp.dot(ctx.astype(bf), wo_ref[...],
                   preferred_element_type=jnp.float32) + bo_ref[...]

    # ---- residual + LayerNorm1 (post-norm), f32 element-wise path.
    x1 = _layer_norm(x + attn, ln1w_ref[...], ln1b_ref[...])

    # ---- feed-forward: relu(x1 W1 + b1) W2 + b2.  Bias+ReLU+bf16-cast fused
    # so only the bf16 copy of the (rows, D_FF) intermediate materializes.
    h1 = jnp.maximum(
        jnp.dot(x1.astype(bf), w1_ref[...],
                preferred_element_type=jnp.float32) + b1_ref[...],
        0.0).astype(bf)
    ff = jnp.dot(h1, w2_ref[...],
                 preferred_element_type=jnp.float32) + b2_ref[...]

    # ---- residual + LayerNorm2.
    x2 = _layer_norm(x1 + ff, ln2w_ref[...], ln2b_ref[...])
    o_ref[...] = x2.reshape(Bt, S, D).astype(o_ref.dtype)


def _pick_batch_tile(B, S, target_rows=512):
    """Batch tile Bt (divisor of B) giving ~target_rows rows per grid step,
    while guaranteeing >=2 grid steps whenever B >= 2 (v7x has 2 TensorCores;
    a 1-step grid would leave one idle)."""
    bt = max(1, min(B, max(1, target_rows // max(S, 1))))
    while B % bt:
        bt -= 1
    if B >= 2 and B // bt < 2:
        bt = max(1, B // 2)
        while B % bt:
            bt -= 1
    return bt


def make_params(key):
    """Deterministic synthetic parameters (shapes from nn.TransformerEncoderLayer)."""
    ks = jax.random.split(key, 8)
    std = 0.02
    wq = jax.random.normal(ks[0], (D_MODEL, D_MODEL), jnp.float32) * std
    wk = jax.random.normal(ks[1], (D_MODEL, D_MODEL), jnp.float32) * std
    wv = jax.random.normal(ks[2], (D_MODEL, D_MODEL), jnp.float32) * std
    wo = jax.random.normal(ks[3], (D_MODEL, D_MODEL), jnp.float32) * std
    w1 = jax.random.normal(ks[4], (D_MODEL, D_FF), jnp.float32) * std
    w2 = jax.random.normal(ks[5], (D_FF, D_MODEL), jnp.float32) * std
    bq = jax.random.normal(ks[6], (1, D_MODEL), jnp.float32) * std
    bk = jnp.zeros((1, D_MODEL), jnp.float32)
    bv = jax.random.normal(ks[7], (1, D_MODEL), jnp.float32) * std
    bo = jnp.zeros((1, D_MODEL), jnp.float32)
    b1 = jnp.zeros((1, D_FF), jnp.float32)
    b2 = jnp.zeros((1, D_MODEL), jnp.float32)
    ln1w = jnp.ones((1, D_MODEL), jnp.float32)
    ln1b = jnp.zeros((1, D_MODEL), jnp.float32)
    ln2w = jnp.ones((1, D_MODEL), jnp.float32)
    ln2b = jnp.zeros((1, D_MODEL), jnp.float32)
    return (wq, bq, wk, bk, wv, bv, wo, bo, ln1w, ln1b,
            w1, b1, w2, b2, ln2w, ln2b)


@jax.jit
def global_encoder_forward(local_reps, params):
    """local_reps: (S, B, D) float32 — PyTorch default (batch_first=False)."""
    (wq, bq, wk, bk, wv, bv, wo, bo, ln1w, ln1b,
     w1, b1, w2, b2, ln2w, ln2b) = params
    S, B, D = local_reps.shape
    assert D == D_MODEL
    # TODO(synk): fold these two HBM transposes away by feeding (S, Bt, D)
    # blocks straight from the (S, B, D) array; that needs either a
    # batch-nonleading dot_general or an in-kernel major-dim transpose whose
    # Mosaic lowering is not exercised here, so the guaranteed path is kept.
    x = jnp.transpose(local_reps, (1, 0, 2))          # (B, S, D) kernel layout

    # Fuse Q/K/V weights (and biases) into single N=384 operands; fold the
    # 1/sqrt(HEAD_DIM) scale into the Q third.  Cast MXU operands to bf16 once.
    scale = 1.0 / (HEAD_DIM ** 0.5)
    bf = jnp.bfloat16
    wqkv = jnp.concatenate([wq * scale, wk, wv], axis=1).astype(bf)    # (D, 3D)
    bqkv = jnp.concatenate([bq * scale, bk, bv], axis=1).astype(jnp.float32)
    wo_b = wo.astype(bf)
    w1_b = w1.astype(bf)
    w2_b = w2.astype(bf)
    # TODO(synk): optional fp8 w1/w2 (per-channel scale folded into b1 / post-dot)
    # on v7x where the FFN dominates FLOPs.

    Bt = _pick_batch_tile(B, S)
    grid = (B // Bt,)

    # Grid-invariant params: constant index maps -> Pallas keeps the same block
    # resident across grid steps (no per-step re-DMA of wqkv/w1/w2 etc.).
    def fixed_spec(p):
        nd = p.ndim
        return pl.BlockSpec(p.shape, lambda b, _nd=nd: (0,) * _nd)

    fixed = (wqkv, wo_b, w1_b, w2_b,
             bqkv, bo, b1, b2, ln1w, ln1b, ln2w, ln2b)

    in_specs = [pl.BlockSpec((Bt, S, D), lambda b: (b, 0, 0))]
    in_specs += [fixed_spec(p) for p in fixed]

    out = pl.pallas_call(
        encoder_layer_kernel,
        out_shape=jax.ShapeDtypeStruct((B, S, D), jnp.float32),
        grid_spec=pltpu.PrefetchScalarGridSpec(
            num_scalar_prefetch=0,
            grid=grid,
            in_specs=in_specs,
            out_specs=pl.BlockSpec((Bt, S, D), lambda b: (b, 0, 0)),
        ),
        compiler_params=pltpu.CompilerParams(
            dimension_semantics=("parallel",),
            # Working set at ~512 rows: bf16 weights ~1.2 MiB + qkv/h1/ff
            # activations (~8-10 MiB incl. the bf16 h1 copy) + double-buffered
            # (Bt,S,D) blocks — comfortably under 32 MiB, which also leaves
            # headroom on v7x's 64 MiB VMEM.
            vmem_limit_bytes=32 << 20,
        ),
    )(x, *fixed)

    return jnp.transpose(out, (1, 0, 2))               # back to (S, B, D)


def _reference_forward(local_reps, params):
    """Pure-JAX reference of the eval-mode forward with matching bf16 matmuls."""
    (wq, bq, wk, bk, wv, bv, wo, bo, ln1w, ln1b,
     w1, b1, w2, b2, ln2w, ln2b) = params
    bf = jnp.bfloat16
    x = jnp.transpose(local_reps, (1, 0, 2)).astype(jnp.float32)   # (B, S, D)
    B, S, D = x.shape
    scale = 1.0 / (HEAD_DIM ** 0.5)

    def ln(t, w, b):
        m = t.mean(-1, keepdims=True)
        v_ = ((t - m) ** 2).mean(-1, keepdims=True)
        return (t - m) / jnp.sqrt(v_ + LN_EPS) * w + b

    def mm(a, w):
        return jnp.dot(a.astype(bf), w.astype(bf),
                       preferred_element_type=jnp.float32)

    q = mm(x, wq * scale) + bq * scale
    k = mm(x, wk) + bk
    v = mm(x, wv) + bv
    qh = q.reshape(B, S, N_HEADS, HEAD_DIM).transpose(0, 2, 1, 3).astype(bf)
    kh = k.reshape(B, S, N_HEADS, HEAD_DIM).transpose(0, 2, 1, 3).astype(bf)
    vh = v.reshape(B, S, N_HEADS, HEAD_DIM).transpose(0, 2, 1, 3).astype(bf)
    s = jnp.einsum('bhqd,bhkd->bhqk', qh, kh, preferred_element_type=jnp.float32)
    p = jax.nn.softmax(s, axis=-1)
    ctx = jnp.einsum('bhqk,bhkd->bhqd', p.astype(bf), vh,
                     preferred_element_type=jnp.float32)
    ctx = ctx.transpose(0, 2, 1, 3).reshape(B, S, D)
    attn = mm(ctx, wo) + bo
    x1 = ln(x + attn, ln1w, ln1b)
    ff = mm(jnp.maximum(mm(x1, w1) + b1, 0.0), w2) + b2
    x2 = ln(x1 + ff, ln2w, ln2b)
    return jnp.transpose(x2, (1, 0, 2))


if __name__ == "__main__":
    key = jax.random.PRNGKey(0)
    k_x, k_x2, k_p = jax.random.split(key, 3)
    params = make_params(k_p)

    # Small check #1: S=8, B=2  -> Bt=1, grid=(2,)  (exercises 2 parallel steps)
    S, B = 8, 2
    local_reps = jax.random.normal(k_x, (S, B, D_MODEL), jnp.float32)
    out = jax.block_until_ready(global_encoder_forward(local_reps, params))
    ref = _reference_forward(local_reps, params)
    assert out.shape == (S, B, D_MODEL)
    assert jnp.allclose(out, ref, rtol=1e-2, atol=1e-2), "mismatch vs reference (B=2)"

    # Small check #2: S=8, B=4  -> Bt=2, grid=(2,)  (exercises Bt>1 batched heads)
    S2, B2 = 8, 4
    local_reps2 = jax.random.normal(k_x2, (S2, B2, D_MODEL), jnp.float32)
    out2 = jax.block_until_ready(global_encoder_forward(local_reps2, params))
    ref2 = _reference_forward(local_reps2, params)
    assert out2.shape == (S2, B2, D_MODEL)
    assert jnp.allclose(out2, ref2, rtol=1e-2, atol=1e-2), "mismatch vs reference (B=4)"

    print("KERNEL_OK")
</pallas_src>

<mosaic_0001>
module attributes {stable_mosaic.version = 11 : i64} {
  func.func @encoder_layer_kernel(%arg0: i32, %arg1: memref<1x8x128xf32, #tpu.memory_space<vmem>>, %arg2: memref<128x384xbf16, #tpu.memory_space<vmem>>, %arg3: memref<128x128xbf16, #tpu.memory_space<vmem>>, %arg4: memref<128x2048xbf16, #tpu.memory_space<vmem>>, %arg5: memref<2048x128xbf16, #tpu.memory_space<vmem>>, %arg6: memref<1x384xf32, #tpu.memory_space<vmem>>, %arg7: memref<1x128xf32, #tpu.memory_space<vmem>>, %arg8: memref<1x2048xf32, #tpu.memory_space<vmem>>, %arg9: memref<1x128xf32, #tpu.memory_space<vmem>>, %arg10: memref<1x128xf32, #tpu.memory_space<vmem>>, %arg11: memref<1x128xf32, #tpu.memory_space<vmem>>, %arg12: memref<1x128xf32, #tpu.memory_space<vmem>>, %arg13: memref<1x128xf32, #tpu.memory_space<vmem>>, %arg14: memref<1x8x128xf32, #tpu.memory_space<vmem>>) attributes {dimension_semantics = [#tpu.dimension_semantics<parallel>], iteration_bounds = array<i64: 2>, scalar_prefetch = 0 : i64, scratch_operands = 0 : i64, tpu.core_type = #tpu.core_type<tc>, window_params = [{transform_indices = @transform_0, window_bounds = array<i64: 1, 8, 128>}, {pipeline_mode = #tpu.pipeline_mode<synchronous>, transform_indices = @transform_1, window_bounds = array<i64: 128, 384>}, {pipeline_mode = #tpu.pipeline_mode<synchronous>, transform_indices = @transform_2, window_bounds = array<i64: 128, 128>}, {pipeline_mode = #tpu.pipeline_mode<synchronous>, transform_indices = @transform_3, window_bounds = array<i64: 128, 2048>}, {pipeline_mode = #tpu.pipeline_mode<synchronous>, transform_indices = @transform_4, window_bounds = array<i64: 2048, 128>}, {pipeline_mode = #tpu.pipeline_mode<synchronous>, transform_indices = @transform_5, window_bounds = array<i64: 1, 384>}, {pipeline_mode = #tpu.pipeline_mode<synchronous>, transform_indices = @transform_6, window_bounds = array<i64: 1, 128>}, {pipeline_mode = #tpu.pipeline_mode<synchronous>, transform_indices = @transform_7, window_bounds = array<i64: 1, 2048>}, {pipeline_mode = #tpu.pipeline_mode<synchronous>, transform_indices = @transform_8, window_bounds = array<i64: 1, 128>}, {pipeline_mode = #tpu.pipeline_mode<synchronous>, transform_indices = @transform_9, window_bounds = array<i64: 1, 128>}, {pipeline_mode = #tpu.pipeline_mode<synchronous>, transform_indices = @transform_10, window_bounds = array<i64: 1, 128>}, {pipeline_mode = #tpu.pipeline_mode<synchronous>, transform_indices = @transform_11, window_bounds = array<i64: 1, 128>}, {pipeline_mode = #tpu.pipeline_mode<synchronous>, transform_indices = @transform_12, window_bounds = array<i64: 1, 128>}, {transform_indices = @transform_13, window_bounds = array<i64: 1, 8, 128>}]} {
    %c0 = arith.constant 0 : index
    %c0_0 = arith.constant 0 : index
    %c0_1 = arith.constant 0 : index
    %0 = vector.load %arg1[%c0, %c0_0, %c0_1] : memref<1x8x128xf32, #tpu.memory_space<vmem>>, vector<1x8x128xf32>
    %1 = vector.shape_cast %0 : vector<1x8x128xf32> to vector<8x128xf32>
    %2 = arith.truncf %1 : vector<8x128xf32> to vector<8x128xbf16>
    %c0_2 = arith.constant 0 : index
    %c0_3 = arith.constant 0 : index
    %3 = vector.load %arg2[%c0_2, %c0_3] : memref<128x384xbf16, #tpu.memory_space<vmem>>, vector<128x384xbf16>
    %cst = arith.constant dense<0.000000e+00> : vector<8x384xf32>
    %4 = tpu.matmul %2, %3, %cst {dimension_numbers = #tpu.dot_dimension_numbers<[1], [0], [0], [1], [0, 0, 1, 1], [], []>} : vector<8x128xbf16>, vector<128x384xbf16>, vector<8x384xf32> -> vector<8x384xf32>
    %c0_4 = arith.constant 0 : index
    %c0_5 = arith.constant 0 : index
    %5 = vector.load %arg6[%c0_4, %c0_5] : memref<1x384xf32, #tpu.memory_space<vmem>>, vector<1x384xf32>
    %6 = vector.broadcast %5 : vector<1x384xf32> to vector<8x384xf32>
    %7 = arith.addf %4, %6 : vector<8x384xf32>
    %8 = vector.extract_strided_slice %7 {offsets = [0, 0], sizes = [8, 128], strides = [1, 1]} : vector<8x384xf32> to vector<8x128xf32>
    %9 = arith.truncf %8 : vector<8x128xf32> to vector<8x128xbf16>
    %10 = vector.shape_cast %9 : vector<8x128xbf16> to vector<1x8x128xbf16>
    %11 = vector.extract_strided_slice %7 {offsets = [0, 128], sizes = [8, 128], strides = [1, 1]} : vector<8x384xf32> to vector<8x128xf32>
    %12 = arith.truncf %11 : vector<8x128xf32> to vector<8x128xbf16>
    %13 = vector.shape_cast %12 : vector<8x128xbf16> to vector<1x8x128xbf16>
    %14 = vector.extract_strided_slice %7 {offsets = [0, 256], sizes = [8, 128], strides = [1, 1]} : vector<8x384xf32> to vector<8x128xf32>
    %15 = arith.truncf %14 : vector<8x128xf32> to vector<8x128xbf16>
    %16 = vector.shape_cast %15 : vector<8x128xbf16> to vector<1x8x128xbf16>
    %17 = vector.extract_strided_slice %10 {offsets = [0, 0, 0], sizes = [1, 8, 32], strides = [1, 1, 1]} : vector<1x8x128xbf16> to vector<1x8x32xbf16>
    %18 = vector.extract_strided_slice %13 {offsets = [0, 0, 0], sizes = [1, 8, 32], strides = [1, 1, 1]} : vector<1x8x128xbf16> to vector<1x8x32xbf16>
    %19 = vector.extract_strided_slice %16 {offsets = [0, 0, 0], sizes = [1, 8, 32], strides = [1, 1, 1]} : vector<1x8x128xbf16> to vector<1x8x32xbf16>
    "tpu.trace_start"() <{level = 10 : i32, message = "bqd,bkd->bqk"}> : () -> ()
    %cst_6 = arith.constant dense<0.000000e+00> : vector<1x8x8xf32>
    %20 = tpu.matmul %17, %18, %cst_6 {dimension_numbers = #tpu.dot_dimension_numbers<[2], [2], [1], [1], [0, 0, 0, 1, 1, 1], [0], [0]>} : vector<1x8x32xbf16>, vector<1x8x32xbf16>, vector<1x8x8xf32> -> vector<1x8x8xf32>
    "tpu.trace_stop"() : () -> ()
    %cst_7 = arith.constant dense<0xFF800000> : vector<1x8xf32>
    %21 = vector.multi_reduction <maximumf>, %20, %cst_7 [2] : vector<1x8x8xf32> to vector<1x8xf32>
    %22 = vector.shape_cast %21 : vector<1x8xf32> to vector<1x8x1xf32>
    %23 = vector.broadcast %22 : vector<1x8x1xf32> to vector<1x8x8xf32>
    %24 = arith.subf %20, %23 : vector<1x8x8xf32>
    %25 = math.exp %24 : vector<1x8x8xf32>
    %cst_8 = arith.constant dense<0.000000e+00> : vector<1x8xf32>
    %26 = vector.multi_reduction <add>, %25, %cst_8 [2] : vector<1x8x8xf32> to vector<1x8xf32>
    %27 = vector.shape_cast %26 : vector<1x8xf32> to vector<1x8x1xf32>
    %28 = tpu.reciprocal %27 {approx = true} : vector<1x8x1xf32> -> vector<1x8x1xf32>
    %29 = vector.broadcast %28 : vector<1x8x1xf32> to vector<1x8x8xf32>
    %30 = arith.mulf %25, %29 : vector<1x8x8xf32>
    %31 = arith.truncf %30 : vector<1x8x8xf32> to vector<1x8x8xbf16>
    "tpu.trace_start"() <{level = 10 : i32, message = "bqk,bkd->bqd"}> : () -> ()
    %cst_9 = arith.constant dense<0.000000e+00> : vector<1x8x32xf32>
    %32 = tpu.matmul %31, %19, %cst_9 {dimension_numbers = #tpu.dot_dimension_numbers<[2], [1], [1], [2], [0, 0, 0, 1, 1, 2], [0], [0]>} : vector<1x8x8xbf16>, vector<1x8x32xbf16>, vector<1x8x32xf32> -> vector<1x8x32xf32>
    "tpu.trace_stop"() : () -> ()
    %33 = vector.extract_strided_slice %10 {offsets = [0, 0, 32], sizes = [1, 8, 32], strides = [1, 1, 1]} : vector<1x8x128xbf16> to vector<1x8x32xbf16>
    %34 = vector.extract_strided_slice %13 {offsets = [0, 0, 32], sizes = [1, 8, 32], strides = [1, 1, 1]} : vector<1x8x128xbf16> to vector<1x8x32xbf16>
    %35 = vector.extract_strided_slice %16 {offsets = [0, 0, 32], sizes = [1, 8, 32], strides = [1, 1, 1]} : vector<1x8x128xbf16> to vector<1x8x32xbf16>
    "tpu.trace_start"() <{level = 10 : i32, message = "bqd,bkd->bqk"}> : () -> ()
    %cst_10 = arith.constant dense<0.000000e+00> : vector<1x8x8xf32>
    %36 = tpu.matmul %33, %34, %cst_10 {dimension_numbers = #tpu.dot_dimension_numbers<[2], [2], [1], [1], [0, 0, 0, 1, 1, 1], [0], [0]>} : vector<1x8x32xbf16>, vector<1x8x32xbf16>, vector<1x8x8xf32> -> vector<1x8x8xf32>
    "tpu.trace_stop"() : () -> ()
    %cst_11 = arith.constant dense<0xFF800000> : vector<1x8xf32>
    %37 = vector.multi_reduction <maximumf>, %36, %cst_11 [2] : vector<1x8x8xf32> to vector<1x8xf32>
    %38 = vector.shape_cast %37 : vector<1x8xf32> to vector<1x8x1xf32>
    %39 = vector.broadcast %38 : vector<1x8x1xf32> to vector<1x8x8xf32>
    %40 = arith.subf %36, %39 : vector<1x8x8xf32>
    %41 = math.exp %40 : vector<1x8x8xf32>
    %cst_12 = arith.constant dense<0.000000e+00> : vector<1x8xf32>
    %42 = vector.multi_reduction <add>, %41, %cst_12 [2] : vector<1x8x8xf32> to vector<1x8xf32>
    %43 = vector.shape_cast %42 : vector<1x8xf32> to vector<1x8x1xf32>
    %44 = tpu.reciprocal %43 {approx = true} : vector<1x8x1xf32> -> vector<1x8x1xf32>
    %45 = vector.broadcast %44 : vector<1x8x1xf32> to vector<1x8x8xf32>
    %46 = arith.mulf %41, %45 : vector<1x8x8xf32>
    %47 = arith.truncf %46 : vector<1x8x8xf32> to vector<1x8x8xbf16>
    "tpu.trace_start"() <{level = 10 : i32, message = "bqk,bkd->bqd"}> : () -> ()
    %cst_13 = arith.constant dense<0.000000e+00> : vector<1x8x32xf32>
    %48 = tpu.matmul %47, %35, %cst_13 {dimension_numbers = #tpu.dot_dimension_numbers<[2], [1], [1], [2], [0, 0, 0, 1, 1, 2], [0], [0]>} : vector<1x8x8xbf16>, vector<1x8x32xbf16>, vector<1x8x32xf32> -> vector<1x8x32xf32>
    "tpu.trace_stop"() : () -> ()
    %49 = vector.extract_strided_slice %10 {offsets = [0, 0, 64], sizes = [1, 8, 32], strides = [1, 1, 1]} : vector<1x8x128xbf16> to vector<1x8x32xbf16>
    %50 = vector.extract_strided_slice %13 {offsets = [0, 0, 64], sizes = [1, 8, 32], strides = [1, 1, 1]} : vector<1x8x128xbf16> to vector<1x8x32xbf16>
    %51 = vector.extract_strided_slice %16 {offsets = [0, 0, 64], sizes = [1, 8, 32], strides = [1, 1, 1]} : vector<1x8x128xbf16> to vector<1x8x32xbf16>
    "tpu.trace_start"() <{level = 10 : i32, message = "bqd,bkd->bqk"}> : () -> ()
    %cst_14 = arith.constant dense<0.000000e+00> : vector<1x8x8xf32>
    %52 = tpu.matmul %49, %50, %cst_14 {dimension_numbers = #tpu.dot_dimension_numbers<[2], [2], [1], [1], [0, 0, 0, 1, 1, 1], [0], [0]>} : vector<1x8x32xbf16>, vector<1x8x32xbf16>, vector<1x8x8xf32> -> vector<1x8x8xf32>
    "tpu.trace_stop"() : () -> ()
    %cst_15 = arith.constant dense<0xFF800000> : vector<1x8xf32>
    %53 = vector.multi_reduction <maximumf>, %52, %cst_15 [2] : vector<1x8x8xf32> to vector<1x8xf32>
    %54 = vector.shape_cast %53 : vector<1x8xf32> to vector<1x8x1xf32>
    %55 = vector.broadcast %54 : vector<1x8x1xf32> to vector<1x8x8xf32>
    %56 = arith.subf %52, %55 : vector<1x8x8xf32>
    %57 = math.exp %56 : vector<1x8x8xf32>
    %cst_16 = arith.constant dense<0.000000e+00> : vector<1x8xf32>
    %58 = vector.multi_reduction <add>, %57, %cst_16 [2] : vector<1x8x8xf32> to vector<1x8xf32>
    %59 = vector.shape_cast %58 : vector<1x8xf32> to vector<1x8x1xf32>
    %60 = tpu.reciprocal %59 {approx = true} : vector<1x8x1xf32> -> vector<1x8x1xf32>
    %61 = vector.broadcast %60 : vector<1x8x1xf32> to vector<1x8x8xf32>
    %62 = arith.mulf %57, %61 : vector<1x8x8xf32>
    %63 = arith.truncf %62 : vector<1x8x8xf32> to vector<1x8x8xbf16>
    "tpu.trace_start"() <{level = 10 : i32, message = "bqk,bkd->bqd"}> : () -> ()
    %cst_17 = arith.constant dense<0.000000e+00> : vector<1x8x32xf32>
    %64 = tpu.matmul %63, %51, %cst_17 {dimension_numbers = #tpu.dot_dimension_numbers<[2], [1], [1], [2], [0, 0, 0, 1, 1, 2], [0], [0]>} : vector<1x8x8xbf16>, vector<1x8x32xbf16>, vector<1x8x32xf32> -> vector<1x8x32xf32>
    "tpu.trace_stop"() : () -> ()
    %65 = vector.extract_strided_slice %10 {offsets = [0, 0, 96], sizes = [1, 8, 32], strides = [1, 1, 1]} : vector<1x8x128xbf16> to vector<1x8x32xbf16>
    %66 = vector.extract_strided_slice %13 {offsets = [0, 0, 96], sizes = [1, 8, 32], strides = [1, 1, 1]} : vector<1x8x128xbf16> to vector<1x8x32xbf16>
    %67 = vector.extract_strided_slice %16 {offsets = [0, 0, 96], sizes = [1, 8, 32], strides = [1, 1, 1]} : vector<1x8x128xbf16> to vector<1x8x32xbf16>
    "tpu.trace_start"() <{level = 10 : i32, message = "bqd,bkd->bqk"}> : () -> ()
    %cst_18 = arith.constant dense<0.000000e+00> : vector<1x8x8xf32>
    %68 = tpu.matmul %65, %66, %cst_18 {dimension_numbers = #tpu.dot_dimension_numbers<[2], [2], [1], [1], [0, 0, 0, 1, 1, 1], [0], [0]>} : vector<1x8x32xbf16>, vector<1x8x32xbf16>, vector<1x8x8xf32> -> vector<1x8x8xf32>
    "tpu.trace_stop"() : () -> ()
    %cst_19 = arith.constant dense<0xFF800000> : vector<1x8xf32>
    %69 = vector.multi_reduction <maximumf>, %68, %cst_19 [2] : vector<1x8x8xf32> to vector<1x8xf32>
    %70 = vector.shape_cast %69 : vector<1x8xf32> to vector<1x8x1xf32>
    %71 = vector.broadcast %70 : vector<1x8x1xf32> to vector<1x8x8xf32>
    %72 = arith.subf %68, %71 : vector<1x8x8xf32>
    %73 = math.exp %72 : vector<1x8x8xf32>
    %cst_20 = arith.constant dense<0.000000e+00> : vector<1x8xf32>
    %74 = vector.multi_reduction <add>, %73, %cst_20 [2] : vector<1x8x8xf32> to vector<1x8xf32>
    %75 = vector.shape_cast %74 : vector<1x8xf32> to vector<1x8x1xf32>
    %76 = tpu.reciprocal %75 {approx = true} : vector<1x8x1xf32> -> vector<1x8x1xf32>
    %77 = vector.broadcast %76 : vector<1x8x1xf32> to vector<1x8x8xf32>
    %78 = arith.mulf %73, %77 : vector<1x8x8xf32>
    %79 = arith.truncf %78 : vector<1x8x8xf32> to vector<1x8x8xbf16>
    "tpu.trace_start"() <{level = 10 : i32, message = "bqk,bkd->bqd"}> : () -> ()
    %cst_21 = arith.constant dense<0.000000e+00> : vector<1x8x32xf32>
    %80 = tpu.matmul %79, %67, %cst_21 {dimension_numbers = #tpu.dot_dimension_numbers<[2], [1], [1], [2], [0, 0, 0, 1, 1, 2], [0], [0]>} : vector<1x8x8xbf16>, vector<1x8x32xbf16>, vector<1x8x32xf32> -> vector<1x8x32xf32>
    "tpu.trace_stop"() : () -> ()
    %81 = tpu.concatenate %32, %48, %64, %80 in 2 : vector<1x8x32xf32>, vector<1x8x32xf32>, vector<1x8x32xf32>, vector<1x8x32xf32> -> vector<1x8x128xf32>
    %82 = vector.shape_cast %81 : vector<1x8x128xf32> to vector<8x128xf32>
    %83 = arith.truncf %82 : vector<8x128xf32> to vector<8x128xbf16>
    %c0_22 = arith.constant 0 : index
    %c0_23 = arith.constant 0 : index
    %84 = vector.load %arg3[%c0_22, %c0_23] : memref<128x128xbf16, #tpu.memory_space<vmem>>, vector<128x128xbf16>
    %cst_24 = arith.constant dense<0.000000e+00> : vector<8x128xf32>
    %85 = tpu.matmul %83, %84, %cst_24 {dimension_numbers = #tpu.dot_dimension_numbers<[1], [0], [0], [1], [0, 0, 1, 1], [], []>} : vector<8x128xbf16>, vector<128x128xbf16>, vector<8x128xf32> -> vector<8x128xf32>
    %c0_25 = arith.constant 0 : index
    %c0_26 = arith.constant 0 : index
    %86 = vector.load %arg7[%c0_25, %c0_26] : memref<1x128xf32, #tpu.memory_space<vmem>>, vector<1x128xf32>
    %87 = vector.broadcast %86 : vector<1x128xf32> to vector<8x128xf32>
    %88 = arith.addf %85, %87 : vector<8x128xf32>
    %89 = arith.addf %1, %88 : vector<8x128xf32>
    %c0_27 = arith.constant 0 : index
    %c0_28 = arith.constant 0 : index
    %90 = vector.load %arg10[%c0_27, %c0_28] : memref<1x128xf32, #tpu.memory_space<vmem>>, vector<1x128xf32>
    %c0_29 = arith.constant 0 : index
    %c0_30 = arith.constant 0 : index
    %91 = vector.load %arg11[%c0_29, %c0_30] : memref<1x128xf32, #tpu.memory_space<vmem>>, vector<1x128xf32>
    %cst_31 = arith.constant dense<0.000000e+00> : vector<8xf32>
    %92 = vector.multi_reduction <add>, %89, %cst_31 [1] : vector<8x128xf32> to vector<8xf32>
    %93 = vector.shape_cast %92 : vector<8xf32> to vector<8x1xf32>
    %cst_32 = arith.constant 1.280000e+02 : f32
    %94 = vector.broadcast %cst_32 : f32 to vector<8x1xf32>
    %95 = arith.divf %93, %94 : vector<8x1xf32>
    %96 = vector.broadcast %95 : vector<8x1xf32> to vector<8x128xf32>
    %97 = arith.subf %89, %96 : vector<8x128xf32>
    %98 = arith.mulf %97, %97 : vector<8x128xf32>
    %cst_33 = arith.constant dense<0.000000e+00> : vector<8xf32>
    %99 = vector.multi_reduction <add>, %98, %cst_33 [1] : vector<8x128xf32> to vector<8xf32>
    %100 = vector.shape_cast %99 : vector<8xf32> to vector<8x1xf32>
    %cst_34 = arith.constant 1.280000e+02 : f32
    %101 = vector.broadcast %cst_34 : f32 to vector<8x1xf32>
    %102 = arith.divf %100, %101 : vector<8x1xf32>
    %cst_35 = arith.constant 9.99999974E-6 : f32
    %103 = vector.broadcast %cst_35 : f32 to vector<8x1xf32>
    %104 = arith.addf %102, %103 : vector<8x1xf32>
    %105 = math.rsqrt %104 : vector<8x1xf32>
    %106 = vector.broadcast %95 : vector<8x1xf32> to vector<8x128xf32>
    %107 = arith.subf %89, %106 : vector<8x128xf32>
    %108 = vector.broadcast %105 : vector<8x1xf32> to vector<8x128xf32>
    %109 = arith.mulf %107, %108 : vector<8x128xf32>
    %110 = vector.broadcast %90 : vector<1x128xf32> to vector<8x128xf32>
    %111 = arith.mulf %109, %110 : vector<8x128xf32>
    %112 = vector.broadcast %91 : vector<1x128xf32> to vector<8x128xf32>
    %113 = arith.addf %111, %112 : vector<8x128xf32>
    %114 = arith.truncf %113 : vector<8x128xf32> to vector<8x128xbf16>
    %c0_36 = arith.constant 0 : index
    %c0_37 = arith.constant 0 : index
    %115 = vector.load %arg4[%c0_36, %c0_37] : memref<128x2048xbf16, #tpu.memory_space<vmem>>, vector<128x2048xbf16>
    %cst_38 = arith.constant dense<0.000000e+00> : vector<8x2048xf32>
    %116 = tpu.matmul %114, %115, %cst_38 {dimension_numbers = #tpu.dot_dimension_numbers<[1], [0], [0], [1], [0, 0, 1, 1], [], []>} : vector<8x128xbf16>, vector<128x2048xbf16>, vector<8x2048xf32> -> vector<8x2048xf32>
    %c0_39 = arith.constant 0 : index
    %c0_40 = arith.constant 0 : index
    %117 = vector.load %arg8[%c0_39, %c0_40] : memref<1x2048xf32, #tpu.memory_space<vmem>>, vector<1x2048xf32>
    %118 = vector.broadcast %117 : vector<1x2048xf32> to vector<8x2048xf32>
    %119 = arith.addf %116, %118 : vector<8x2048xf32>
    %cst_41 = arith.constant 0.000000e+00 : f32
    %120 = vector.broadcast %cst_41 : f32 to vector<8x2048xf32>
    %121 = arith.maximumf %119, %120 : vector<8x2048xf32>
    %122 = arith.truncf %121 : vector<8x2048xf32> to vector<8x2048xbf16>
    %c0_42 = arith.constant 0 : index
    %c0_43 = arith.constant 0 : index
    %123 = vector.load %arg5[%c0_42, %c0_43] : memref<2048x128xbf16, #tpu.memory_space<vmem>>, vector<2048x128xbf16>
    %cst_44 = arith.constant dense<0.000000e+00> : vector<8x128xf32>
    %124 = tpu.matmul %122, %123, %cst_44 {dimension_numbers = #tpu.dot_dimension_numbers<[1], [0], [0], [1], [0, 0, 1, 1], [], []>} : vector<8x2048xbf16>, vector<2048x128xbf16>, vector<8x128xf32> -> vector<8x128xf32>
    %c0_45 = arith.constant 0 : index
    %c0_46 = arith.constant 0 : index
    %125 = vector.load %arg9[%c0_45, %c0_46] : memref<1x128xf32, #tpu.memory_space<vmem>>, vector<1x128xf32>
    %126 = vector.broadcast %125 : vector<1x128xf32> to vector<8x128xf32>
    %127 = arith.addf %124, %126 : vector<8x128xf32>
    %128 = arith.addf %113, %127 : vector<8x128xf32>
    %c0_47 = arith.constant 0 : index
    %c0_48 = arith.constant 0 : index
    %129 = vector.load %arg12[%c0_47, %c0_48] : memref<1x128xf32, #tpu.memory_space<vmem>>, vector<1x128xf32>
    %c0_49 = arith.constant 0 : index
    %c0_50 = arith.constant 0 : index
    %130 = vector.load %arg13[%c0_49, %c0_50] : memref<1x128xf32, #tpu.memory_space<vmem>>, vector<1x128xf32>
    %cst_51 = arith.constant dense<0.000000e+00> : vector<8xf32>
    %131 = vector.multi_reduction <add>, %128, %cst_51 [1] : vector<8x128xf32> to vector<8xf32>
    %132 = vector.shape_cast %131 : vector<8xf32> to vector<8x1xf32>
    %cst_52 = arith.constant 1.280000e+02 : f32
    %133 = vector.broadcast %cst_52 : f32 to vector<8x1xf32>
    %134 = arith.divf %132, %133 : vector<8x1xf32>
    %135 = vector.broadcast %134 : vector<8x1xf32> to vector<8x128xf32>
    %136 = arith.subf %128, %135 : vector<8x128xf32>
    %137 = arith.mulf %136, %136 : vector<8x128xf32>
    %cst_53 = arith.constant dense<0.000000e+00> : vector<8xf32>
    %138 = vector.multi_reduction <add>, %137, %cst_53 [1] : vector<8x128xf32> to vector<8xf32>
    %139 = vector.shape_cast %138 : vector<8xf32> to vector<8x1xf32>
    %cst_54 = arith.constant 1.280000e+02 : f32
    %140 = vector.broadcast %cst_54 : f32 to vector<8x1xf32>
    %141 = arith.divf %139, %140 : vector<8x1xf32>
    %cst_55 = arith.constant 9.99999974E-6 : f32
    %142 = vector.broadcast %cst_55 : f32 to vector<8x1xf32>
    %143 = arith.addf %141, %142 : vector<8x1xf32>
    %144 = math.rsqrt %143 : vector<8x1xf32>
    %145 = vector.broadcast %134 : vector<8x1xf32> to vector<8x128xf32>
    %146 = arith.subf %128, %145 : vector<8x128xf32>
    %147 = vector.broadcast %144 : vector<8x1xf32> to vector<8x128xf32>
    %148 = arith.mulf %146, %147 : vector<8x128xf32>
    %149 = vector.broadcast %129 : vector<1x128xf32> to vector<8x128xf32>
    %150 = arith.mulf %148, %149 : vector<8x128xf32>
    %151 = vector.broadcast %130 : vector<1x128xf32> to vector<8x128xf32>
    %152 = arith.addf %150, %151 : vector<8x128xf32>
    %153 = vector.shape_cast %152 : vector<8x128xf32> to vector<1x8x128xf32>
    %c0_56 = arith.constant 0 : index
    %c0_57 = arith.constant 0 : index
    %c0_58 = arith.constant 0 : index
    %154 = vector.load %arg14[%c0_56, %c0_57, %c0_58] : memref<1x8x128xf32, #tpu.memory_space<vmem>>, vector<1x8x128xf32>
    tpu.vector_store %arg14[%c0_56, %c0_57, %c0_58], %153 {strides = array<i32>} : memref<1x8x128xf32, #tpu.memory_space<vmem>>, vector<1x8x128xf32>,
    return
  }
  func.func @transform_0(%arg0: i32) -> (i32, i32, i32) {
    %c0_i32 = arith.constant 0 : i32
    %c0_i32_0 = arith.constant 0 : i32
    %c0_i32_1 = arith.constant 0 : i32
    return %arg0, %c0_i32, %c0_i32_0 : i32, i32, i32
  }
  func.func @transform_1(%arg0: i32) -> (i32, i32) {
    %c0_i32 = arith.constant 0 : i32
    %c0_i32_0 = arith.constant 0 : i32
    %c0_i32_1 = arith.constant 0 : i32
    return %c0_i32, %c0_i32_0 : i32, i32
  }
  func.func @transform_2(%arg0: i32) -> (i32, i32) {
    %c0_i32 = arith.constant 0 : i32
    %c0_i32_0 = arith.constant 0 : i32
    %c0_i32_1 = arith.constant 0 : i32
    return %c0_i32, %c0_i32_0 : i32, i32
  }
  func.func @transform_3(%arg0: i32) -> (i32, i32) {
    %c0_i32 = arith.constant 0 : i32
    %c0_i32_0 = arith.constant 0 : i32
    %c0_i32_1 = arith.constant 0 : i32
    return %c0_i32, %c0_i32_0 : i32, i32
  }
  func.func @transform_4(%arg0: i32) -> (i32, i32) {
    %c0_i32 = arith.constant 0 : i32
    %c0_i32_0 = arith.constant 0 : i32
    %c0_i32_1 = arith.constant 0 : i32
    return %c0_i32, %c0_i32_0 : i32, i32
  }
  func.func @transform_5(%arg0: i32) -> (i32, i32) {
    %c0_i32 = arith.constant 0 : i32
    %c0_i32_0 = arith.constant 0 : i32
    %c0_i32_1 = arith.constant 0 : i32
    return %c0_i32, %c0_i32_0 : i32, i32
  }
  func.func @transform_6(%arg0: i32) -> (i32, i32) {
    %c0_i32 = arith.constant 0 : i32
    %c0_i32_0 = arith.constant 0 : i32
    %c0_i32_1 = arith.constant 0 : i32
    return %c0_i32, %c0_i32_0 : i32, i32
  }
  func.func @transform_7(%arg0: i32) -> (i32, i32) {
    %c0_i32 = arith.constant 0 : i32
    %c0_i32_0 = arith.constant 0 : i32
    %c0_i32_1 = arith.constant 0 : i32
    return %c0_i32, %c0_i32_0 : i32, i32
  }
  func.func @transform_8(%arg0: i32) -> (i32, i32) {
    %c0_i32 = arith.constant 0 : i32
    %c0_i32_0 = arith.constant 0 : i32
    %c0_i32_1 = arith.constant 0 : i32
    return %c0_i32, %c0_i32_0 : i32, i32
  }
  func.func @transform_9(%arg0: i32) -> (i32, i32) {
    %c0_i32 = arith.constant 0 : i32
    %c0_i32_0 = arith.constant 0 : i32
    %c0_i32_1 = arith.constant 0 : i32
    return %c0_i32, %c0_i32_0 : i32, i32
  }
  func.func @transform_10(%arg0: i32) -> (i32, i32) {
    %c0_i32 = arith.constant 0 : i32
    %c0_i32_0 = arith.constant 0 : i32
    %c0_i32_1 = arith.constant 0 : i32
    return %c0_i32, %c0_i32_0 : i32, i32
  }
  func.func @transform_11(%arg0: i32) -> (i32, i32) {
    %c0_i32 = arith.constant 0 : i32
    %c0_i32_0 = arith.constant 0 : i32
    %c0_i32_1 = arith.constant 0 : i32
    return %c0_i32, %c0_i32_0 : i32, i32
  }
  func.func @transform_12(%arg0: i32) -> (i32, i32) {
    %c0_i32 = arith.constant 0 : i32
    %c0_i32_0 = arith.constant 0 : i32
    %c0_i32_1 = arith.constant 0 : i32
    return %c0_i32, %c0_i32_0 : i32, i32
  }
  func.func @transform_13(%arg0: i32) -> (i32, i32, i32) {
    %c0_i32 = arith.constant 0 : i32
    %c0_i32_0 = arith.constant 0 : i32
    %c0_i32_1 = arith.constant 0 : i32
    return %arg0, %c0_i32, %c0_i32_0 : i32, i32, i32
  }
}

</mosaic_0001>

<bundles_post_ra>
// kernel: global_encoder_forward.1
= control target key start
LH: loop header
LB: loop body
LE: loop exit
PB: predicated region body
PF: predicated region fallthrough
CT: control target
= control target key end

     0   :  { %s4961_s25 = smov 0   ;;  %s6449_s0 = inlined_call_operand.vmem [shape: f32[2,8,128], index: 0, kind: input, shape index: {}]   ;;  %s6450_s1 = inlined_call_operand.vmem [shape: bf16[128,384], index: 1, kind: input, shape index: {}]   ;;  %s6451_s2 = inlined_call_operand.vmem [shape: bf16[128,128], index: 2, kind: input, shape index: {}]   ;;  %s6452_s3 = inlined_call_operand.vmem [shape: bf16[128,2048], index: 3, kind: input, shape index: {}]   ;;  %s6453_s4 = inlined_call_operand.vmem [shape: bf16[2048,128], index: 4, kind: input, shape index: {}]   ;;  %s6454_s5 = inlined_call_operand.vmem [shape: f32[1,384], index: 5, kind: input, shape index: {}]   ;;  %s6455_s6 = inlined_call_operand.vmem [shape: f32[1,128], index: 6, kind: input, shape index: {}]   ;;  %s6456_s7 = inlined_call_operand.vmem [shape: f32[1,2048], index: 7, kind: input, shape index: {}]   ;;  %s6457_s8 = inlined_call_operand.vmem [shape: f32[1,128], index: 8, kind: input, shape index: {}]   ;;  %s6458_s9 = inlined_call_operand.vmem [shape: f32[1,128], index: 9, kind: input, shape index: {}]   ;;  %s6459_s10 = inlined_call_operand.vmem [shape: f32[1,128], index: 10, kind: input, shape index: {}]   ;;  %s6460_s11 = inlined_call_operand.vmem [shape: f32[1,128], index: 11, kind: input, shape index: {}]   ;;  %s6461_s12 = inlined_call_operand.vmem [shape: f32[1,128], index: 12, kind: input, shape index: {}]   ;;  %s6462_s13 = inlined_call_operand.vmem [shape: f32[2,8,128], index: 13, kind: output, shape index: {}]  }
   0x1 LB: > { %s3382_s26 = sadd.s32 4294967295, %s4885_s25   ;;  %p3386_p0 = scmp.ge.s32.totalorder %s4885_s25, 1  ;;  %s4885_s25 = sphi %s4961_s25, %s23_s25  }
   0x2   : > { %p386_p1 = scmp.lt.s32.totalorder %s4885_s25, 3 }
   0x4   : > { %p387_p2 = pnand %p3386_p0, %p386_p1 }
   0x5   : > { %p428_p3 = scmp.lt.s32.totalorder (!%p387_p2), %s3382_s26, 1  ;;  %s4887_s24 = smov (!%p387_p2), 64  }
   0x6   : > { %390 = sbr.rel (%p387_p2) target bundleno = 2264 (0x8d8), region = 72  ;;  %s4888_s27 = smov (!%p387_p2), 96  }
   0x7   : > { %s4889_s28 = smov (!%p387_p2), 32  }
   0xb   : > { %v3475_v0 = vld [vmem:[%s6450_s1 + $0xa8] sm:$0xf]  ;;  %v4573_v1 = vld [vmem:[%s6450_s1 + $0xb0] sm:$0xf0]  ;;  %v4572_v2 = vld [vmem:[%s6450_s1 + $0xac] sm:$0xf] }
   0xc   : > { %v3476_v3 = vor.u32 %v4573_v1, %v3475_v0  ;;  %v3477_v4 = vld [vmem:[%s6450_s1 + $0xb4] sm:$0xf0]  ;;  %v3463_v5 = vld [vmem:[%s6450_s1 + $0x90] sm:$0xf]  ;;  %v4570_v6 = vld [vmem:[%s6450_s1 + $0x98] sm:$0xf0] }
   0xd   : > { %v3480_v7 = vor.u32 %v4572_v2, %v3477_v4  ;;  %v4569_v8 = vld [vmem:[%s6450_s1 + $0x94] sm:$0xf]  ;;  %v3465_v9 = vld [vmem:[%s6450_s1 + $0x9c] sm:$0xf0]  ;;  %v3464_v10 = vor.u32 %v4570_v6, %v3463_v5  ;;  %v3451_v12 = vld [vmem:[%s6450_s1 + $0x78] sm:$0xf] }
   0xe   : > { %607 = vmatpush.bf16.msra.mxu0 %v3476_v3  ;;  %v3468_v11 = vor.u32 %v4569_v8, %v3465_v9  ;;  %v4567_v13 = vld [vmem:[%s6450_s1 + $0x80] sm:$0xf0]  ;;  %v4566_v14 = vld [vmem:[%s6450_s1 + $0x7c] sm:$0xf]  ;;  %v3453_v15 = vld [vmem:[%s6450_s1 + $0x84] sm:$0xf0] }
   0xf   : > { %620 = vmatpush.bf16.msra.mxu1 %v3480_v7  ;;  %v3452_v16 = vor.u32 %v4567_v13, %v3451_v12  ;;  %v3456_v17 = vor.u32 %v4566_v14, %v3453_v15  ;;  %v3439_v18 = vld [vmem:[%s6450_s1 + $0x60] sm:$0xf]  ;;  %v4564_v19 = vld [vmem:[%s6450_s1 + $0x68] sm:$0xf0]  ;;  %v4563_v20 = vld [vmem:[%s6450_s1 + $0x64] sm:$0xf] }
  0x10   : > { %v3441_v21 = vld [vmem:[%s6450_s1 + $0x6c] sm:$0xf0]  ;;  %v3440_v22 = vor.u32 %v4564_v19, %v3439_v18  ;;  %v4574_v24 = vld [vmem:[%s6450_s1 + $0xb8] sm:$0xf0]  ;;  %v3471_v25 = vld [vmem:[%s6450_s1 + $0x98] sm:$0xf] }
  0x11   : > { %v3483_v23 = vld [vmem:[%s6450_s1 + $0xb0] sm:$0xf]  ;;  %v3444_v26 = vor.u32 %v4563_v20, %v3441_v21  ;;  %v3427_v27 = vld [vmem:[%s6450_s1 + $0x48] sm:$0xf]  ;;  %v4561_v28 = vld [vmem:[%s6450_s1 + $0x50] sm:$0xf0] }
  0x12   : > { %608 = vmatpush.bf16.msra.mxu0 %v3464_v10  ;;  %v3484_v29 = vor.u32 %v4574_v24, %v3483_v23  ;;  %v4571_v30 = vld [vmem:[%s6450_s1 + $0xa0] sm:$0xf0]  ;;  %v4560_v31 = vld [vmem:[%s6450_s1 + $0x4c] sm:$0xf]  ;;  %v3429_v32 = vld [vmem:[%s6450_s1 + $0x54] sm:$0xf0]  ;;  %v3428_v34 = vor.u32 %v4561_v28, %v3427_v27 }
  0x13   : > { %621 = vmatpush.bf16.msra.mxu1 %v3468_v11  ;;  %v3472_v33 = vor.u32 %v4571_v30, %v3471_v25  ;;  %v3415_v35 = vld [vmem:[%s6450_s1 + $0x30] sm:$0xf]  ;;  %v3459_v36 = vld [vmem:[%s6450_s1 + $0x80] sm:$0xf]  ;;  %v4568_v37 = vld [vmem:[%s6450_s1 + $0x88] sm:$0xf0]  ;;  %v3432_v38 = vor.u32 %v4560_v31, %v3429_v32 }
  0x14   : > { %633 = vmatpush.bf16.msra.mxu2 %v3484_v29  ;;  %v4558_v39 = vld [vmem:[%s6450_s1 + $0x38] sm:$0xf0]  ;;  %v4557_v40 = vld [vmem:[%s6450_s1 + $0x34] sm:$0xf]  ;;  %v3417_v41 = vld [vmem:[%s6450_s1 + $0x3c] sm:$0xf0]  ;;  %v3460_v43 = vor.u32 %v4568_v37, %v3459_v36 }
  0x15   : > { %s6464_s26 = smov (!%p428_p3, %s3382_s26), 1  ;;  %v3447_v42 = vld [vmem:[%s6450_s1 + $0x68] sm:$0xf]  ;;  %v4565_v44 = vld [vmem:[%s6450_s1 + $0x70] sm:$0xf0]  ;;  %v3416_v45 = vor.u32 %v4558_v39, %v3415_v35  ;;  %v3420_v46 = vor.u32 %v4557_v40, %v3417_v41  ;;  %vm649_vm0 = vcmask 261120  }
  0x16   : > { %609 = vmatpush.bf16.msra.mxu0 %v3452_v16  ;;  %v3403_v47 = vld [vmem:[%s6450_s1 + $0x18] sm:$0xf]  ;;  %v4555_v48 = vld [vmem:[%s6450_s1 + $0x20] sm:$0xf0]  ;;  %v4554_v49 = vld [vmem:[%s6450_s1 + $0x1c] sm:$0xf]  ;;  %v3448_v51 = vor.u32 %v4565_v44, %v3447_v42 }
  0x17   : > { %622 = vmatpush.bf16.msra.mxu1 %v3456_v17  ;;  %v3405_v50 = vld [vmem:[%s6450_s1 + $0x24] sm:$0xf0]  ;;  %s3387_s22 = sshll.u32 %s6464_s26, 3  ;;  %v3404_v52 = vor.u32 %v4555_v48, %v3403_v47  ;;  %v3435_v53 = vld [vmem:[%s6450_s1 + $0x50] sm:$0xf]  ;;  %vm685_vm1 = vcmask 1043456  }
  0x18   : > { %634 = vmatpush.bf16.msra.mxu2 %v3472_v33  ;;  %v4562_v54 = vld [vmem:[%s6450_s1 + $0x58] sm:$0xf0]  ;;  %v3408_v55 = vor.u32 %v4554_v49, %v3405_v50  ;;  %v3391_v56 = vld [vmem:[%s6450_s1] sm:$0xf]  ;;  %v4552_v57 = vld [vmem:[%s6450_s1 + $0x8] sm:$0xf0]  ;;  %s431_s18 = scalar_lea.vmem %s6449_s0, %s3387_s22  ;;  %s435_s16 = scalar_lea.vmem %s6462_s13, %s3387_s22 }
  0x19   : > { %v4551_v58 = vld [vmem:[%s6450_s1 + $0x4] sm:$0xf]  ;;  %v3393_v59 = vld [vmem:[%s6450_s1 + $0xc] sm:$0xf0]  ;;  %v3436_v60 = vor.u32 %v4562_v54, %v3435_v53  ;;  %v3392_v61 = vor.u32 %v4552_v57, %v3391_v56  ;;  %v3423_v63 = vld [vmem:[%s6450_s1 + $0x38] sm:$0xf] }
  0x1a   : > { %610 = vmatpush.bf16.msra.mxu0 %v3440_v22  ;;  %v5107_v62 = vld [vmem:[%s431_s18] sm:$0xff]  ;;  %v3396_v1 = vor.u32 %v4551_v58, %v3393_v59  ;;  %v4556_v5 = vld [vmem:[%s6450_s1 + $0x28] sm:$0xf0]  ;;  %v3399_v7 = vld [vmem:[%s6450_s1 + $0x8] sm:$0xf]  ;;  %vm669_vm2 = vcmask 64512  }
  0x1b   : > { %623 = vmatpush.bf16.msra.mxu1 %v3444_v26  ;;  %v4559_v0 = vld [vmem:[%s6450_s1 + $0x40] sm:$0xf0]  ;;  %v438_v2 = vpack.c.bf16 %v5107_v62, %v5107_v62  ;;  %v3411_v4 = vld [vmem:[%s6450_s1 + $0x20] sm:$0xf]  ;;  %v4553_v8 = vld [vmem:[%s6450_s1 + $0x10] sm:$0xf0] }
  0x1c   : > { %635 = vmatpush.bf16.msra.mxu2 %v3460_v43  ;;  %v3424_v3 = vor.u32 %v4559_v0, %v3423_v63  ;;  %v3412_v6 = vor.u32 %v4556_v5, %v3411_v4  ;;  %v3400_v9 = vor.u32 %v4553_v8, %v3399_v7  ;;  %v471_v10 = vld [vmem:[%s6454_s5] sm:$0x7]  ;;  %vm892_vm3 = vcmask 523264  }
  0x1d   : > { %v473_v11 = vperm.slane %v471_v10, 0  ;;  %v474_v12 = vperm.slane %v471_v10, 1  ;;  %v475_v27 = vperm.slane %v471_v10, 2  ;;  %vm894_vm4 = vcmask 785408  }
  0x1e   : > { %611 = vmatpush.bf16.msra.mxu0 %v3428_v34 }
  0x1f   : > { %624 = vmatpush.bf16.msra.mxu1 %v3432_v38 }
  0x20   : > { %636 = vmatpush.bf16.msra.mxu2 %v3448_v51 }
  0x22   : > { %612 = vmatpush.bf16.msra.mxu0 %v3416_v45 }
  0x23   : > { %625 = vmatpush.bf16.msra.mxu1 %v3420_v46 }
  0x24   : > { %637 = vmatpush.bf16.msra.mxu2 %v3436_v60 }
  0x26   : > { %613 = vmatpush.bf16.msra.mxu0 %v3404_v52 }
  0x27   : > { %626 = vmatpush.bf16.msra.mxu1 %v3408_v55 }
  0x28   : > { %638 = vmatpush.bf16.msra.mxu2 %v3424_v3 }
  0x2a   : > { %614 = vmatpush.bf16.msra.mxu0 %v3392_v61 }
  0x2b   : > { %627 = vmatpush.bf16.msra.mxu1 %v3396_v1 }
  0x2c   : > { %639 = vmatpush.bf16.msra.mxu2 %v3412_v6 }
  0x2d   : > { %615 = vmatmul.bf16.vlgmr.msra.gmra.mxu0 %v438_v2 }
  0x2e   : > { %628 = vmatmul.bf16.vlgmr.msra.gmra.mxu1 %v438_v2 }
  0x30   : > { %640 = vmatpush.bf16.msra.mxu2 %v3400_v9 }
  0x33   : > { %641 = vmatmul.bf16.vlgmr.msra.gmra.mxu2 %v438_v2 }
  0xaa   : > { %v616_v13 = vpop.f32.mrf.mxu0 }
  0xab   : > { %v629_v14 = vpop.f32.mrf.mxu1  ;;  %v617_v15 = vadd.f32 %v616_v13, %v473_v11 }
  0xac   : > { %v630_v16 = vadd.f32 %v629_v14, %v474_v12 }
  0xad   : > { %v646_v18 = vpack.c.bf16 %v617_v15, %v617_v15 }
  0xae   : > { %v647_v17 = vpack.c.bf16 %v630_v16, %v630_v16 }
  0xaf   : > { %v703_v24 = vunpack.c.l.b16 %v646_v18 }
  0xb0   : > { %v708_v19 = vunpack.c.l.b16 %v647_v17  ;;  %v654_v20 = vsel %vm649_vm0, %v647_v17, 0 }
  0xb1   : > { %663 = vmatpush.bf16.xpose.msra.mxu3 %v654_v20  ;;  %v704_v25 = vpack.c.b16 %v703_v24, %v703_v24 }
  0xb2   : > { %v709_v21 = vpack.c.b16 %v708_v19, %v708_v19  ;;  %v618_v22 = vpop.f32.mrf.mxu0 }
  0xb3   : > { %v631_v23 = vpop.f32.mrf.mxu1 }
  0xb4   : > { %769 = vrot.lane.b32.xlu2 %v709_v21, %s4887_s24  ;;  %710 = vrot.lane.b32.xlu1 %v709_v21, %s4888_s27 }
  0xb6   : > { %v642_v26 = vpop.f32.mrf.mxu2 }
  0xb7   : > { %v643_v28 = vadd.f32 %v642_v26, %v475_v27 }
  0xb8   : > { %3485 = vmatmul.msk.bf16.vlgmr.msra.gmra.mxu3 %vm649_vm0, %v646_v18 }
  0xb9   : > { %v648_v30 = vpack.c.bf16 %v643_v28, %v643_v28 }
  0xbb   : > { %v687_v31 = vsel %vm685_vm1, %v648_v30, 0  ;;  %v744_v1 = vunpack.c.l.b16 %v648_v30 }
  0xbc   : > { %825 = vrot.lane.b32.xlu2 %v709_v21, %s4889_s28  ;;  %705 = vrot.lane.b32.xlu1 %v704_v25, %s4888_s27 }
  0xbd   : > { %696 = vmatpush.bf16.msrb.mxu3 %v687_v31  ;;  %v745_v2 = vpack.c.b16 %v744_v1, %v744_v1 }
  0xbe   : > { %v644_v29 = vpop.f32.mrf.mxu2 }
  0xc4   : > { %823 = vrot.lane.b32.xlu1 %v704_v25, %s4889_s28 }
 0x10e   : > { %v770_v32 = vpop.permute.xlu2 %769 }
 0x10f   : > { %v775_v33 = vsel %vm649_vm0, %v770_v32, 0 }
 0x110   : > { %784 = vmatpush.bf16.xpose.msrb.mxu2 %v775_v33 }
 0x116   : > { %v826_v47 = vpop.permute.xlu2 %825 }
 0x117   : > { %v831_v49 = vsel %vm649_vm0, %v826_v47, 0  ;;  %v4577_v47 = vld [vmem:[%s6451_s2 + $0x10] sm:$0xff] }
 0x126   : > { %v711_v34 = vpop.permute.xlu1 %710 }
 0x127   : > { %v716_v35 = vsel %vm649_vm0, %v711_v34, 0 }
 0x128   : > { %725 = vmatpush.bf16.xpose.msra.mxu3 %v716_v35 }
 0x12e   : > { %v706_v51 = vpop.permute.xlu1 %705 }
 0x136   : > { %v824_v52 = vpop.permute.xlu1 %823 }
 0x13b   : > { %v665_v36 = vpop.f32.mrf.mxu3 }
 0x13c   : > { %v670_v37 = vsel %vm669_vm2, %v665_v36, -inf }
 0x13d   : > { %671 = vmax.xlane.f32.xlu0 %v670_v37 }
 0x143   : > { %v667_v38 = vpop.f32.mrf.mxu3 }
 0x1b0   : > { %v672_v39 = vpop.xlane.xlu0 %671 }
 0x1b1   : > { %v673_v40 = vsub.f32 %v665_v36, %v672_v39 }
 0x1b3   : > { %v674_v41 = vmul.f32 1.442695, %v673_v40 }
 0x1b5   : > { %4857 = vpow2.f32 %v674_v41 }
 0x1bb   : > { %v4858_v42 = vpop.eup %4857 }
 0x1bc   : > { %v676_v43 = vsel %vm669_vm2, %v4858_v42, 0.0 }
 0x1bd   : > { %677 = vadd.xlane.f32.xlu0 %v676_v43  ;;  %v4581_v43 = vld [vmem:[%s6451_s2 + $0x30] sm:$0xff] }
 0x1d1   : > { %767 = vrot.lane.b32.xlu0 %v704_v25, %s4887_s24 }
 0x230   : > { %v678_v44 = vpop.xlane.xlu0 %677 }
 0x231   : > { %4859 = vrcp.f32 %v678_v44  ;;  %v4580_v44 = vld [vmem:[%s6451_s2 + $0x28] sm:$0xff] }
 0x237   : > { %v4860_v45 = vpop.eup %4859 }
 0x238   : > { %v680_v46 = vmul.f32 %v4860_v45, %v4858_v42  ;;  %v4582_v42 = vld [vmem:[%s6451_s2 + $0x38] sm:$0xff]  ;;  %v4579_v45 = vld [vmem:[%s6451_s2 + $0x20] sm:$0xff] }
 0x239   : > { %965 = vmatpush.bf16.msrb.mxu1 %v4582_v42  ;;  %v4656_v42 = vld [vmem:[%s6452_s3 + $0x244] sm:$0xf0] }
 0x23a   : > { %v681_v48 = vpack.c.bf16 %v680_v46, %v680_v46  ;;  %v4578_v46 = vld [vmem:[%s6451_s2 + $0x18] sm:$0xff] }
 0x23c   : > { %3486 = vmatmul.msk.bf16.vlgmr.msrb.gmra.mxu3 %vm669_vm2, %v681_v48  ;;  %v4576_v48 = vld [vmem:[%s6451_s2 + $0x8] sm:$0xff] }
 0x23d   : > { %840 = vmatpush.bf16.xpose.msrb.mxu3 %v831_v49  ;;  %966 = vmatpush.bf16.msrb.mxu1 %v4581_v43  ;;  %v4575_v49 = vld [vmem:[%s6451_s2] sm:$0xff]  ;;  %v4648_v43 = vld [vmem:[%s6452_s3 + $0x20c] sm:$0xf] }
 0x241   : > { %967 = vmatpush.bf16.msrb.mxu1 %v4580_v44  ;;  %v3793_v44 = vld [vmem:[%s6452_s3 + $0x248] sm:$0xf0] }
 0x243   : > { %v768_v50 = vpop.permute.xlu0 %767 }
 0x244   : > { %3489 = vmatmul.msk.bf16.vlgmr.msrb.gmra.mxu2 %vm649_vm0, %v768_v50 }
 0x245   : > { %968 = vmatpush.bf16.msrb.mxu1 %v4579_v45 }
 0x249   : > { %969 = vmatpush.bf16.msrb.mxu1 %v4578_v46 }
 0x24c   : > { %3487 = vmatmul.msk.bf16.vlgmr.msra.gmra.mxu3 %vm649_vm0, %v706_v51 }
 0x24d   : > { %970 = vmatpush.bf16.msrb.mxu1 %v4577_v47 }
 0x251   : > { %971 = vmatpush.bf16.msrb.mxu1 %v4576_v48 }
 0x255   : > { %972 = vmatpush.bf16.msrb.mxu1 %v4575_v49  ;;  %v3719_v49 = vld [vmem:[%s6452_s3 + $0x180] sm:$0xf] }
 0x25c   : > { %3491 = vmatmul.msk.bf16.vlgmr.msrb.gmra.mxu3 %vm649_vm0, %v824_v52 }
 0x2bf   : > { %v5150_v53 = vpop.f32.mrf.mxu3 }
 0x2c7   : > { %v700_v54 = vpop.f32.mrf.mxu3  ;;  %v786_v55 = vpop.f32.mrf.mxu2 }
 0x2c8   : > { %v790_v56 = vsel %vm669_vm2, %v786_v55, -inf }
 0x2c9   : > { %791 = vmax.xlane.f32.xlu1 %v790_v56 }
 0x2cf   : > { %v727_v57 = vpop.f32.mrf.mxu3  ;;  %v788_v58 = vpop.f32.mrf.mxu2 }
 0x2d0   : > { %v731_v59 = vsel %vm669_vm2, %v727_v57, -inf  ;;  %v4851_v58 = vld [vmem:[%s6455_s6] ss:$0 sm:$0xff] }
 0x2d1   : > { %732 = vmax.xlane.f32.xlu2 %v731_v59 }
 0x2d7   : > { %v729_v60 = vpop.f32.mrf.mxu3 }
 0x2df   : > { %v842_v61 = vpop.f32.mrf.mxu3 }
 0x2e0   : > { %v846_v63 = vsel %vm669_vm2, %v842_v61, -inf }
 0x2e1   : > { %847 = vmax.xlane.f32.xlu0 %v846_v63 }
 0x2e7   : > { %v844_v0 = vpop.f32.mrf.mxu3 }
 0x2e8   : > { %v4890_v0 = vmov 128.0  }
 0x2f5   : > { %802 = vrot.lane.b32.xlu0 %v745_v2, %s4887_s24 }
 0x33c   : > { %v792_v3 = vpop.xlane.xlu1 %791 }
 0x33d   : > { %v793_v4 = vsub.f32 %v786_v55, %v792_v3  ;;  %v4703_v3 = vld [vmem:[%s6452_s3 + $0x3bc] sm:$0xf0] }
 0x33f   : > { %v794_v5 = vmul.f32 1.442695, %v793_v4 }
 0x341   : > { %4861 = vpow2.f32 %v794_v5  ;;  %v3977_v5 = vld [vmem:[%s6452_s3 + $0x3c0] sm:$0xf0] }
 0x344   : > { %v733_v6 = vpop.xlane.xlu2 %732 }
 0x345   : > { %v734_v7 = vsub.f32 %v727_v57, %v733_v6  ;;  %v3983_v6 = vld [vmem:[%s6452_s3 + $0x388] sm:$0xf] }
 0x347   : > { %v4862_v8 = vpop.eup %4861  ;;  %v735_v9 = vmul.f32 1.442695, %v734_v7  ;;  %v4704_v7 = vld [vmem:[%s6452_s3 + $0x3c4] sm:$0xf0] }
 0x348   : > { %v796_v10 = vsel %vm669_vm2, %v4862_v8, 0.0 }
 0x349   : > { %4863 = vpow2.f32 %v735_v9  ;;  %797 = vadd.xlane.f32.xlu1 %v796_v10  ;;  %v3984_v9 = vor.u32 %v4704_v7, %v3983_v6  ;;  %v4696_v10 = vld [vmem:[%s6452_s3 + $0x38c] sm:$0xf]  ;;  %v4624_v6 = vld [vmem:[%s6452_s3 + $0x144] sm:$0xf0] }
 0x34a   : > { %v4616_v7 = vld [vmem:[%s6452_s3 + $0x10c] sm:$0xf] }
 0x34f   : > { %v4864_v11 = vpop.eup %4863 }
 0x350   : > { %v737_v12 = vsel %vm669_vm2, %v4864_v11, 0.0 }
 0x351   : > { %738 = vadd.xlane.f32.xlu2 %v737_v12  ;;  %v3911_v12 = vld [vmem:[%s6452_s3 + $0x300] sm:$0xf] }
 0x354   : > { %v848_v13 = vpop.xlane.xlu0 %847 }
 0x355   : > { %v849_v14 = vsub.f32 %v842_v61, %v848_v13 }
 0x357   : > { %v850_v15 = vmul.f32 1.442695, %v849_v14  ;;  %v4687_v14 = vld [vmem:[%s6452_s3 + $0x33c] sm:$0xf0] }
 0x359   : > { %4865 = vpow2.f32 %v850_v15  ;;  %v4679_v15 = vld [vmem:[%s6452_s3 + $0x304] sm:$0xf] }
 0x35f   : > { %v4866_v16 = vpop.eup %4865 }
 0x360   : > { %v852_v17 = vsel %vm669_vm2, %v4866_v16, 0.0 }
 0x361   : > { %853 = vadd.xlane.f32.xlu1 %v852_v17  ;;  %v3912_v17 = vor.u32 %v4687_v14, %v3911_v12  ;;  %v4607_v14 = vld [vmem:[%s6452_s3 + $0xbc] sm:$0xf0] }
 0x367   : > { %v803_v18 = vpop.permute.xlu0 %802 }
 0x368   : > { %v808_v19 = vsel %vm685_vm1, %v803_v18, 0 }
 0x369   : > { %746 = vrot.lane.b32.xlu2 %v745_v2, %s4888_s27  ;;  %817 = vmatpush.bf16.msra.mxu2 %v808_v19  ;;  %v3919_v19 = vld [vmem:[%s6452_s3 + $0x308] sm:$0xf] }
 0x37a   : > { %858 = vrot.lane.b32.xlu1 %v745_v2, %s4889_s28  ;;  %v3975_v2 = vld [vmem:[%s6452_s3 + $0x380] sm:$0xf] }
 0x37b   : > { %v3976_v4 = vor.u32 %v4703_v3, %v3975_v2  ;;  %v4623_v2 = vld [vmem:[%s6452_s3 + $0x13c] sm:$0xf0]  ;;  %v4615_v3 = vld [vmem:[%s6452_s3 + $0x104] sm:$0xf] }
 0x37d   : > { %1821 = vmatpush.bf16.msrb.mxu2 %v3976_v4  ;;  %v3657_v4 = vld [vmem:[%s6452_s3 + $0x140] sm:$0xf0] }
 0x381   : > { %1822 = vmatpush.bf16.msrb.mxu2 %v3912_v17  ;;  %v3593_v17 = vld [vmem:[%s6452_s3 + $0xc0] sm:$0xf0] }
 0x3bc   : > { %v798_v20 = vpop.xlane.xlu1 %797 }
 0x3bd   : > { %4867 = vrcp.f32 %v798_v20  ;;  %v4688_v20 = vld [vmem:[%s6452_s3 + $0x344] sm:$0xf0] }
 0x3c3   : > { %v4868_v21 = vpop.eup %4867 }
 0x3c4   : > { %v800_v22 = vmul.f32 %v4868_v21, %v4862_v8  ;;  %v739_v23 = vpop.xlane.xlu2 %738  ;;  %v4680_v21 = vld [vmem:[%s6452_s3 + $0x30c] sm:$0xf] }
 0x3c5   : > { %4869 = vrcp.f32 %v739_v23  ;;  %v3921_v23 = vld [vmem:[%s6452_s3 + $0x348] sm:$0xf0] }
 0x3c6   : > { %v801_v24 = vpack.c.bf16 %v800_v22, %v800_v22  ;;  %v3920_v22 = vor.u32 %v4688_v20, %v3919_v19  ;;  %v4608_v19 = vld [vmem:[%s6452_s3 + $0xc4] sm:$0xf0]  ;;  %v4600_v20 = vld [vmem:[%s6452_s3 + $0x8c] sm:$0xf] }
 0x3c8   : > { %3490 = vmatmul.msk.bf16.vlgmr.msra.gmra.mxu2 %vm669_vm2, %v801_v24  ;;  %v3847_v24 = vld [vmem:[%s6452_s3 + $0x280] sm:$0xf] }
 0x3cb   : > { %v4870_v25 = vpop.eup %4869 }
 0x3cc   : > { %v741_v26 = vmul.f32 %v4870_v25, %v4864_v11  ;;  %v747_v27 = vpop.permute.xlu2 %746  ;;  %v3985_v11 = vld [vmem:[%s6452_s3 + $0x3c8] sm:$0xf0]  ;;  %v4671_v25 = vld [vmem:[%s6452_s3 + $0x2bc] sm:$0xf0] }
 0x3cd   : > { %v752_v28 = vsel %vm685_vm1, %v747_v27, 0  ;;  %v3988_v13 = vor.u32 %v4696_v10, %v3985_v11  ;;  %v4663_v27 = vld [vmem:[%s6452_s3 + $0x284] sm:$0xf]  ;;  %v3660_v11 = vor.u32 %v4615_v3, %v3657_v4  ;;  %v4673_v4 = vld [vmem:[%s6452_s3 + $0x2cc] sm:$0xf0] }
 0x3ce   : > { %761 = vmatpush.bf16.msrb.mxu0 %v752_v28  ;;  %v742_v29 = vpack.c.bf16 %v741_v26, %v741_v26  ;;  %v3924_v26 = vor.u32 %v4680_v21, %v3921_v23  ;;  %v3849_v28 = vld [vmem:[%s6452_s3 + $0x2c0] sm:$0xf0]  ;;  %v3601_v21 = vld [vmem:[%s6452_s3 + $0xc8] sm:$0xf0] }
 0x3cf   : > { %1860 = vmatpush.bf16.msra.mxu1 %v3988_v13  ;;  %v3591_v13 = vld [vmem:[%s6452_s3 + $0x80] sm:$0xf] }
 0x3d0   : > { %v3592_v23 = vor.u32 %v4607_v14, %v3591_v13  ;;  %v3873_v13 = vld [vmem:[%s6452_s3 + $0x2d8] sm:$0xf0] }
 0x3d1   : > { %3488 = vmatmul.msk.bf16.vlgmr.msrb.gmra.mxu0 %vm669_vm2, %v742_v29  ;;  %v3855_v29 = vld [vmem:[%s6452_s3 + $0x288] sm:$0xf] }
 0x3d3   : > { %1861 = vmatpush.bf16.msra.mxu1 %v3924_v26 }
 0x3d4   : > { %v854_v30 = vpop.xlane.xlu1 %853 }
 0x3d5   : > { %4871 = vrcp.f32 %v854_v30  ;;  %v3848_v30 = vor.u32 %v4671_v25, %v3847_v24 }
 0x3d6   : > { %4873 = vrcp.f32 %v4890_v0 }
 0x3d7   : > { %1823 = vmatpush.bf16.msrb.mxu2 %v3848_v30  ;;  %v3527_v30 = vld [vmem:[%s6452_s3] sm:$0xf] }
 0x3db   : > { %v4872_v31 = vpop.eup %4871 }
 0x3dc   : > { %v856_v32 = vmul.f32 %v4872_v31, %v4866_v16  ;;  %v3913_v16 = vld [vmem:[%s6452_s3 + $0x340] sm:$0xf0]  ;;  %v4672_v31 = vld [vmem:[%s6452_s3 + $0x2c4] sm:$0xf0] }
 0x3dd   : > { %v3916_v18 = vor.u32 %v4679_v15, %v3913_v16  ;;  %v4599_v15 = vld [vmem:[%s6452_s3 + $0x84] sm:$0xf] }
 0x3de   : > { %v857_v35 = vpack.c.bf16 %v856_v32, %v856_v32  ;;  %v4664_v32 = vld [vmem:[%s6452_s3 + $0x28c] sm:$0xf]  ;;  %v3596_v24 = vor.u32 %v4599_v15, %v3593_v17  ;;  %v3799_v15 = vld [vmem:[%s6452_s3 + $0x210] sm:$0xf]  ;;  %v4649_v17 = vld [vmem:[%s6452_s3 + $0x214] sm:$0xf] }
 0x3ec   : > { %v859_v33 = vpop.permute.xlu1 %858 }
 0x3ed   : > { %v864_v34 = vsel %vm685_vm1, %v859_v33, 0  ;;  %v3857_v33 = vld [vmem:[%s6452_s3 + $0x2c8] sm:$0xf0] }
 0x3ee   : > { %873 = vmatpush.bf16.msra.mxu0 %v864_v34  ;;  %v3852_v34 = vor.u32 %v4663_v27, %v3849_v28  ;;  %v3604_v27 = vor.u32 %v4600_v20, %v3601_v21  ;;  %v3807_v20 = vld [vmem:[%s6452_s3 + $0x218] sm:$0xf] }
 0x3ef   : > { %v4658_v21 = vld [vmem:[%s6452_s3 + $0x254] sm:$0xf0] }
 0x3f1   : > { %3492 = vmatmul.msk.bf16.vlgmr.msra.gmra.mxu0 %vm669_vm2, %v857_v35  ;;  %v3856_v35 = vor.u32 %v4672_v31, %v3855_v29  ;;  %v4591_v31 = vld [vmem:[%s6452_s3 + $0x3c] sm:$0xf0] }
 0x3f2   : > { %1847 = vmatpush.bf16.msrb.mxu0 %v3984_v9 }
 0x3f6   : > { %1848 = vmatpush.bf16.msrb.mxu0 %v3920_v22 }
 0x3fa   : > { %1849 = vmatpush.bf16.msrb.mxu0 %v3856_v35  ;;  %v4592_v35 = vld [vmem:[%s6452_s3 + $0x44] sm:$0xf0] }
 0x44b   : > { %v819_v36 = vpop.f32.mrf.mxu2 }
 0x44e   : > { %v763_v37 = vpop.f32.mrf.mxu0 }
 0x44f   : > { %880 = vrot.lane.b32.xlu2 %v763_v37, %s4889_s28  ;;  %v4655_v37 = vld [vmem:[%s6452_s3 + $0x23c] sm:$0xf0] }
 0x453   : > { %v821_v38 = vpop.f32.mrf.mxu2 }
 0x454   : > { %v4647_v38 = vld [vmem:[%s6452_s3 + $0x204] sm:$0xf] }
 0x456   : > { %v765_v39 = vpop.f32.mrf.mxu0 }
 0x457   : > { %884 = vrot.lane.b32.xlu2 %v819_v36, %s4887_s24  ;;  %v3783_v36 = vld [vmem:[%s6452_s3 + $0x200] sm:$0xf]  ;;  %v3860_v39 = vor.u32 %v4664_v32, %v3857_v33  ;;  %v3528_v32 = vor.u32 %v4591_v31, %v3527_v30  ;;  %v3529_v33 = vld [vmem:[%s6452_s3 + $0x40] sm:$0xf0]  ;;  %v4633_v30 = vld [vmem:[%s6452_s3 + $0x194] sm:$0xf] }
 0x458   : > { %v3784_v46 = vor.u32 %v4655_v37, %v3783_v36 }
 0x459   : > { %1862 = vmatpush.bf16.msra.mxu1 %v3860_v39  ;;  %v3537_v39 = vld [vmem:[%s6452_s3 + $0x48] sm:$0xf0] }
 0x45a   : > { %1824 = vmatpush.bf16.msrb.mxu2 %v3784_v46 }
 0x46e   : > { %v875_v40 = vpop.f32.mrf.mxu0 }
 0x46f   : > { %888 = vrot.lane.b32.xlu0 %v875_v40, %s4888_s27  ;;  %v3785_v40 = vld [vmem:[%s6452_s3 + $0x240] sm:$0xf0] }
 0x470   : > { %v3788_v47 = vor.u32 %v4647_v38, %v3785_v40  ;;  %v4584_v38 = vld [vmem:[%s6452_s3 + $0xc] sm:$0xf]  ;;  %v3991_v40 = vld [vmem:[%s6452_s3 + $0x390] sm:$0xf] }
 0x476   : > { %v877_v41 = vpop.f32.mrf.mxu0 }
 0x477   : > { %v3791_v41 = vld [vmem:[%s6452_s3 + $0x208] sm:$0xf] }
 0x478   : > { %v3792_v48 = vor.u32 %v4656_v42, %v3791_v41  ;;  %v3540_v41 = vor.u32 %v4584_v38, %v3537_v39  ;;  %v4705_v42 = vld [vmem:[%s6452_s3 + $0x3cc] sm:$0xf0] }
 0x479   : > { %v3671_v39 = vld [vmem:[%s6452_s3 + $0x110] sm:$0xf] }
 0x47a   : > { %1850 = vmatpush.bf16.msrb.mxu0 %v3792_v48  ;;  %v4706_v48 = vld [vmem:[%s6452_s3 + $0x3d4] sm:$0xf0] }
 0x4a9   : > { %v881_v50 = vpop.permute.xlu2 %880 }
 0x4aa   : > { %v891_v52 = vsel %vm649_vm0, %v5150_v53, %v881_v50  ;;  %v5203_v53 = vpop.eup %4873  ;;  %v4639_v50 = vld [vmem:[%s6452_s3 + $0x1bc] sm:$0xf0] }
 0x4ab   : > { %v5206_v1 = vmul.f32 128.0, %v5203_v53  ;;  %vm988_vm5 = vweird.f32 %v5203_v53 }
 0x4ad   : > { %v985_v45 = vsub.f32 1.0, %v5206_v1  ;;  %v3655_v1 = vld [vmem:[%s6452_s3 + $0x100] sm:$0xf] }
 0x4ae   : > { %v3656_v10 = vor.u32 %v4623_v2, %v3655_v1  ;;  %v3937_v1 = vld [vmem:[%s6452_s3 + $0x358] sm:$0xf0] }
 0x4b1   : > { %v885_v51 = vpop.permute.xlu2 %884 }
 0x4b2   : > { %v893_v54 = vsel %vm892_vm3, %v891_v52, %v885_v51  ;;  %v4631_v51 = vld [vmem:[%s6452_s3 + $0x184] sm:$0xf]  ;;  %v3796_v52 = vor.u32 %v4648_v43, %v3793_v44  ;;  %v4697_v43 = vld [vmem:[%s6452_s3 + $0x394] sm:$0xf] }
 0x4b3   : > { %v3993_v44 = vld [vmem:[%s6452_s3 + $0x3d0] sm:$0xf0] }
 0x4b4   : > { %1863 = vmatpush.bf16.msra.mxu1 %v3796_v52  ;;  %v3996_v46 = vor.u32 %v4697_v43, %v3993_v44  ;;  %v3927_v52 = vld [vmem:[%s6452_s3 + $0x310] sm:$0xf]  ;;  %v3673_v43 = vld [vmem:[%s6452_s3 + $0x150] sm:$0xf0]  ;;  %v3679_v44 = vld [vmem:[%s6452_s3 + $0x118] sm:$0xf] }
 0x4e1   : > { %v889_v55 = vpop.permute.xlu0 %888 }
 0x4e2   : > { %v895_v56 = vsel %vm894_vm4, %v893_v54, %v889_v55  ;;  %v3721_v54 = vld [vmem:[%s6452_s3 + $0x1c0] sm:$0xf0]  ;;  %v3727_v55 = vld [vmem:[%s6452_s3 + $0x188] sm:$0xf] }
 0x4e3   : > { %v896_v57 = vpack.c.bf16 %v895_v56, %v895_v56  ;;  %v4640_v56 = vld [vmem:[%s6452_s3 + $0x1c4] sm:$0xf0] }
 0x4e4   : > { %v3728_v0 = vor.u32 %v4640_v56, %v3727_v55 }
 0x4e5   : > { %973 = vmatmul.bf16.vlgmr.msrb.gmra.mxu1 %v896_v57  ;;  %v4632_v57 = vld [vmem:[%s6452_s3 + $0x18c] sm:$0xf] }
 0x4e6   : > { %1851 = vmatpush.bf16.msrb.mxu0 %v3728_v0  ;;  %v4682_v0 = vld [vmem:[%s6452_s3 + $0x31c] sm:$0xf] }
 0x4e7   : > { %v3940_v3 = vor.u32 %v4682_v0, %v3937_v1  ;;  %v3617_v0 = vld [vmem:[%s6452_s3 + $0xd8] sm:$0xf0] }
 0x562   : > { %v974_v59 = vpop.f32.mrf.mxu1 }
 0x563   : > { %v975_v60 = vadd.f32 %v4851_v58, %v974_v59  ;;  %v3729_v58 = vld [vmem:[%s6452_s3 + $0x1c8] sm:$0xf0]  ;;  %v986_v59 = vmul.f32 %v5203_v53, %v985_v45  ;;  %v3992_v45 = vor.u32 %v4705_v42, %v3991_v40  ;;  %v4625_v40 = vld [vmem:[%s6452_s3 + $0x14c] sm:$0xf0] }
 0x564   : > { %v3672_v42 = vor.u32 %v4625_v40, %v3671_v39  ;;  %v4691_v39 = vld [vmem:[%s6452_s3 + $0x35c] sm:$0xf0] }
 0x565   : > { %v5200_v61 = vadd.f32 %v975_v60, %v5107_v62  ;;  %v4695_v62 = vld [vmem:[%s6452_s3 + $0x384] sm:$0xf]  ;;  %v3720_v60 = vor.u32 %v4639_v50, %v3719_v49  ;;  %v987_v9 = vadd.f32 %v5203_v53, %v986_v59  ;;  %v4698_v49 = vld [vmem:[%s6452_s3 + $0x39c] sm:$0xf]  ;;  %v3935_v59 = vld [vmem:[%s6452_s3 + $0x318] sm:$0xf] }
 0x566   : > { %v3980_v8 = vor.u32 %v4695_v62, %v3977_v5  ;;  %v3732_v62 = vor.u32 %v4632_v57, %v3729_v58  ;;  %v3663_v5 = vld [vmem:[%s6452_s3 + $0x108] sm:$0xf]  ;;  %v4681_v57 = vld [vmem:[%s6452_s3 + $0x314] sm:$0xf] }
 0x567   : > { %981 = vadd.xlane.f32.xlu2 %v5200_v61  ;;  %1825 = vmatpush.bf16.msrb.mxu2 %v3720_v60  ;;  %v3664_v12 = vor.u32 %v4624_v6, %v3663_v5  ;;  %v5381_v22 = vsel %vm988_vm5, %v5203_v53, %v987_v9  ;;  %v3929_v58 = vld [vmem:[%s6452_s3 + $0x350] sm:$0xf0]  ;;  %v4674_v9 = vld [vmem:[%s6452_s3 + $0x2d4] sm:$0xf0] }
 0x568   : > { %1834 = vmatpush.bf16.msra.mxu3 %v3980_v8  ;;  %v3665_v8 = vld [vmem:[%s6452_s3 + $0x148] sm:$0xf0]  ;;  %1864 = vmatpush.bf16.msra.mxu1 %v3732_v62  ;;  %v3932_v60 = vor.u32 %v4681_v57, %v3929_v58  ;;  %v3863_v62 = vld [vmem:[%s6452_s3 + $0x290] sm:$0xf]  ;;  %v4665_v5 = vld [vmem:[%s6452_s3 + $0x294] sm:$0xf] }
 0x569   : > { %v3668_v16 = vor.u32 %v4616_v7, %v3665_v8  ;;  %1852 = vmatpush.bf16.msrb.mxu0 %v3664_v12  ;;  %v3864_v6 = vor.u32 %v4673_v4, %v3863_v62  ;;  %v3865_v7 = vld [vmem:[%s6452_s3 + $0x2d0] sm:$0xf0]  ;;  %v3871_v8 = vld [vmem:[%s6452_s3 + $0x298] sm:$0xf]  ;;  %v4666_v12 = vld [vmem:[%s6452_s3 + $0x29c] sm:$0xf] }
 0x56a   : > { %v976_v63 = vpop.f32.mrf.mxu1  ;;  %v3876_v14 = vor.u32 %v4666_v12, %v3873_v13  ;;  %v3615_v57 = vld [vmem:[%s6452_s3 + $0x98] sm:$0xf]  ;;  %v4585_v62 = vld [vmem:[%s6452_s3 + $0x14] sm:$0xf] }
 0x56b   : > { %v3724_v63 = vor.u32 %v4631_v51, %v3721_v54  ;;  %1826 = vmatpush.bf16.msrb.mxu2 %v3656_v10  ;;  %v4001_v51 = vld [vmem:[%s6452_s3 + $0x3d8] sm:$0xf0]  ;;  %v4689_v54 = vld [vmem:[%s6452_s3 + $0x34c] sm:$0xf0]  ;;  %v3868_v10 = vor.u32 %v4665_v5, %v3865_v7  ;;  %v4610_v58 = vld [vmem:[%s6452_s3 + $0xd4] sm:$0xf0] }
 0x56c   : > { %1835 = vmatpush.bf16.msra.mxu3 %v3916_v18  ;;  %v3599_v18 = vld [vmem:[%s6452_s3 + $0x88] sm:$0xf]  ;;  %1865 = vmatpush.bf16.msra.mxu1 %v3668_v16  ;;  %v4004_v55 = vor.u32 %v4698_v49, %v4001_v51  ;;  %v3928_v56 = vor.u32 %v4689_v54, %v3927_v52  ;;  %v4657_v16 = vld [vmem:[%s6452_s3 + $0x24c] sm:$0xf0]  ;;  %v3681_v49 = vld [vmem:[%s6452_s3 + $0x158] sm:$0xf0] }
 0x56d   : > { %v3600_v25 = vor.u32 %v4608_v19, %v3599_v18  ;;  %v3800_v18 = vor.u32 %v4657_v16, %v3799_v15  ;;  %v3801_v19 = vld [vmem:[%s6452_s3 + $0x250] sm:$0xf0]  ;;  %v3607_v51 = vld [vmem:[%s6452_s3 + $0x90] sm:$0xf]  ;;  %v4594_v7 = vld [vmem:[%s6452_s3 + $0x54] sm:$0xf0] }
 0x56e   : > { %v4609_v52 = vld [vmem:[%s6452_s3 + $0xcc] sm:$0xf0]  ;;  %v4601_v54 = vld [vmem:[%s6452_s3 + $0x94] sm:$0xf] }
 0x56f   : > { %1827 = vmatpush.bf16.msrb.mxu2 %v3592_v23  ;;  %1853 = vmatpush.bf16.msrb.mxu0 %v3600_v25  ;;  %v3804_v23 = vor.u32 %v4649_v17, %v3801_v19  ;;  %v4650_v25 = vld [vmem:[%s6452_s3 + $0x21c] sm:$0xf]  ;;  %v3545_v5 = vld [vmem:[%s6452_s3 + $0x50] sm:$0xf0] }
 0x570   : > { %1836 = vmatpush.bf16.msra.mxu3 %v3852_v34  ;;  %1866 = vmatpush.bf16.msra.mxu1 %v3604_v27  ;;  %v3535_v34 = vld [vmem:[%s6452_s3 + $0x8] sm:$0xf] }
 0x571   : > { %v3536_v37 = vor.u32 %v4592_v35, %v3535_v34 }
 0x573   : > { %1828 = vmatpush.bf16.msrb.mxu2 %v3528_v32  ;;  %1854 = vmatpush.bf16.msrb.mxu0 %v3536_v37  ;;  %v3743_v32 = vld [vmem:[%s6452_s3 + $0x198] sm:$0xf]  ;;  %v3745_v37 = vld [vmem:[%s6452_s3 + $0x1d8] sm:$0xf0] }
 0x574   : > { %1837 = vmatpush.bf16.msra.mxu3 %v3788_v47  ;;  %v3999_v47 = vld [vmem:[%s6452_s3 + $0x398] sm:$0xf]  ;;  %1867 = vmatpush.bf16.msra.mxu1 %v3540_v41  ;;  %v4617_v41 = vld [vmem:[%s6452_s3 + $0x114] sm:$0xf] }
 0x575   : > { %v4000_v50 = vor.u32 %v4706_v48, %v3999_v47  ;;  %v4618_v48 = vld [vmem:[%s6452_s3 + $0x11c] sm:$0xf] }
 0x577   : > { %1873 = vmatpush.bf16.msra.mxu2 %v3992_v45  ;;  %1899 = vmatpush.bf16.msra.mxu0 %v4000_v50  ;;  %v4626_v45 = vld [vmem:[%s6452_s3 + $0x154] sm:$0xf0]  ;;  %v3684_v50 = vor.u32 %v4618_v48, %v3681_v49 }
 0x578   : > { %1838 = vmatpush.bf16.msra.mxu3 %v3724_v63  ;;  %v4690_v63 = vld [vmem:[%s6452_s3 + $0x354] sm:$0xf0]  ;;  %1912 = vmatpush.bf16.msrb.mxu1 %v4004_v55  ;;  %v3680_v47 = vor.u32 %v4626_v45, %v3679_v44  ;;  %v3608_v55 = vor.u32 %v4609_v52, %v3607_v51  ;;  %v3951_v44 = vld [vmem:[%s6452_s3 + $0x328] sm:$0xf]  ;;  %v4675_v51 = vld [vmem:[%s6452_s3 + $0x2dc] sm:$0xf0] }
 0x579   : > { %v3936_v2 = vor.u32 %v4690_v63, %v3935_v59  ;;  %v4602_v63 = vld [vmem:[%s6452_s3 + $0x9c] sm:$0xf]  ;;  %v4692_v45 = vld [vmem:[%s6452_s3 + $0x364] sm:$0xf0] }
 0x57a   : > { %v3620_v1 = vor.u32 %v4602_v63, %v3617_v0  ;;  %v3952_v52 = vor.u32 %v4692_v45, %v3951_v44  ;;  %v4612_v44 = vld [vmem:[%s6452_s3 + $0xe4] sm:$0xf0]  ;;  %v4604_v45 = vld [vmem:[%s6452_s3 + $0xac] sm:$0xf] }
 0x57b   : > { %1874 = vmatpush.bf16.msra.mxu2 %v3928_v56  ;;  %1900 = vmatpush.bf16.msra.mxu0 %v3936_v2  ;;  %v3609_v56 = vld [vmem:[%s6452_s3 + $0xd0] sm:$0xf0]  ;;  %v3543_v2 = vld [vmem:[%s6452_s3 + $0x10] sm:$0xf] }
 0x57c   : > { %1839 = vmatpush.bf16.msra.mxu3 %v3660_v11  ;;  %v3872_v11 = vor.u32 %v4674_v9, %v3871_v8  ;;  %1913 = vmatpush.bf16.msrb.mxu1 %v3940_v3  ;;  %v3612_v59 = vor.u32 %v4601_v54, %v3609_v56  ;;  %v4593_v3 = vld [vmem:[%s6452_s3 + $0x4c] sm:$0xf0]  ;;  %v3548_v8 = vor.u32 %v4585_v62, %v3545_v5  ;;  %v3881_v56 = vld [vmem:[%s6452_s3 + $0x2e0] sm:$0xf0] }
 0x57d   : > { %v3544_v4 = vor.u32 %v4593_v3, %v3543_v2  ;;  %v4659_v2 = vld [vmem:[%s6452_s3 + $0x25c] sm:$0xf0]  ;;  %v3817_v5 = vld [vmem:[%s6452_s3 + $0x260] sm:$0xf0] }
 0x57f   : > { %1875 = vmatpush.bf16.msra.mxu2 %v3864_v6  ;;  %1901 = vmatpush.bf16.msra.mxu0 %v3872_v11  ;;  %v3551_v6 = vld [vmem:[%s6452_s3 + $0x18] sm:$0xf]  ;;  %v3553_v11 = vld [vmem:[%s6452_s3 + $0x58] sm:$0xf0] }
 0x580   : > { %1840 = vmatpush.bf16.msra.mxu3 %v3596_v24  ;;  %v3808_v24 = vor.u32 %v4658_v21, %v3807_v20  ;;  %1914 = vmatpush.bf16.msrb.mxu1 %v3876_v14  ;;  %v3552_v9 = vor.u32 %v4594_v7, %v3551_v6  ;;  %v3823_v6 = vld [vmem:[%s6452_s3 + $0x228] sm:$0xf] }
 0x581   : > { %v4660_v7 = vld [vmem:[%s6452_s3 + $0x264] sm:$0xf0] }
 0x583   : > { %1876 = vmatpush.bf16.msra.mxu2 %v3800_v18  ;;  %1902 = vmatpush.bf16.msra.mxu0 %v3808_v24 }
 0x5da   : > { %v982_v26 = vpop.xlane.xlu2 %981 }
 0x5db   : > { %v990_v28 = vmul.f32 %v5381_v22, %v982_v26  ;;  %v3809_v26 = vld [vmem:[%s6452_s3 + $0x258] sm:$0xf0] }
 0x5dc   : > { %v3812_v27 = vor.u32 %v4650_v25, %v3809_v26  ;;  %v4853_v25 = vld [vmem:[%s6459_s10] ss:$0 sm:$0xff] }
 0x5dd   : > { %v5385_v29 = vsub.f32 %v5200_v61, %v990_v28  ;;  %v4583_v61 = vld [vmem:[%s6452_s3 + $0x4] sm:$0xf]  ;;  %v3735_v28 = vld [vmem:[%s6452_s3 + $0x190] sm:$0xf] }
 0x5de   : > { %v3532_v36 = vor.u32 %v4583_v61, %v3529_v33  ;;  %v3737_v61 = vld [vmem:[%s6452_s3 + $0x1d0] sm:$0xf0]  ;;  %v4642_v33 = vld [vmem:[%s6452_s3 + $0x1d4] sm:$0xf0]  ;;  %1915 = vmatpush.bf16.msrb.mxu1 %v3812_v27 }
 0x5df   : > { %v992_v53 = vmul.f32 %v5385_v29, %v5385_v29  ;;  %v3740_v34 = vor.u32 %v4633_v30, %v3737_v61  ;;  %v3744_v35 = vor.u32 %v4642_v33, %v3743_v32  ;;  %v4699_v30 = vld [vmem:[%s6452_s3 + $0x3a4] sm:$0xf]  ;;  %v4708_v32 = vld [vmem:[%s6452_s3 + $0x3e4] sm:$0xf0]  ;;  %v4700_v33 = vld [vmem:[%s6452_s3 + $0x3ac] sm:$0xf] }
 0x5e0   : > { %1841 = vmatpush.bf16.msra.mxu3 %v3532_v36  ;;  %v4634_v36 = vld [vmem:[%s6452_s3 + $0x19c] sm:$0xf] }
 0x5e1   : > { %993 = vadd.xlane.f32.xlu0 %v992_v53  ;;  %v4641_v53 = vld [vmem:[%s6452_s3 + $0x1cc] sm:$0xf0]  ;;  %v3748_v38 = vor.u32 %v4634_v36, %v3745_v37  ;;  %1903 = vmatpush.bf16.msra.mxu0 %v3744_v35 }
 0x5e2   : > { %v3736_v31 = vor.u32 %v4641_v53, %v3735_v28  ;;  %v4007_v28 = vld [vmem:[%s6452_s3 + $0x3a0] sm:$0xf] }
 0x5e3   : > { %1916 = vmatpush.bf16.msrb.mxu1 %v3748_v38  ;;  %v4707_v53 = vld [vmem:[%s6452_s3 + $0x3dc] sm:$0xf0] }
 0x5e4   : > { %1886 = vmatpush.bf16.msrb.mxu3 %v3996_v46  ;;  %1877 = vmatpush.bf16.msra.mxu2 %v3736_v31  ;;  %v3676_v46 = vor.u32 %v4617_v41, %v3673_v43  ;;  %v4009_v31 = vld [vmem:[%s6452_s3 + $0x3e0] sm:$0xf0]  ;;  %v4008_v36 = vor.u32 %v4707_v53, %v4007_v28  ;;  %v3943_v38 = vld [vmem:[%s6452_s3 + $0x320] sm:$0xf] }
 0x5e5   : > { %1904 = vmatpush.bf16.msra.mxu0 %v3680_v47  ;;  %v4012_v37 = vor.u32 %v4699_v30, %v4009_v31  ;;  %v3945_v43 = vld [vmem:[%s6452_s3 + $0x360] sm:$0xf0]  ;;  %v3953_v47 = vld [vmem:[%s6452_s3 + $0x368] sm:$0xf0]  ;;  %v3944_v48 = vor.u32 %v4691_v39, %v3943_v38  ;;  %v3695_v31 = vld [vmem:[%s6452_s3 + $0x128] sm:$0xf] }
 0x5e6   : > { %v4619_v53 = vld [vmem:[%s6452_s3 + $0x124] sm:$0xf]  ;;  %v4611_v38 = vld [vmem:[%s6452_s3 + $0xdc] sm:$0xf0] }
 0x5e7   : > { %1917 = vmatpush.bf16.msrb.mxu1 %v3684_v50  ;;  %v3879_v50 = vld [vmem:[%s6452_s3 + $0x2a0] sm:$0xf]  ;;  %v3689_v30 = vld [vmem:[%s6452_s3 + $0x160] sm:$0xf0] }
 0x5e8   : > { %1887 = vmatpush.bf16.msrb.mxu3 %v3932_v60  ;;  %1878 = vmatpush.bf16.msra.mxu2 %v3672_v42  ;;  %v3616_v60 = vor.u32 %v4610_v58, %v3615_v57  ;;  %v4683_v42 = vld [vmem:[%s6452_s3 + $0x324] sm:$0xf]  ;;  %v3887_v57 = vld [vmem:[%s6452_s3 + $0x2a8] sm:$0xf]  ;;  %v3880_v63 = vor.u32 %v4675_v51, %v3879_v50  ;;  %v4595_v50 = vld [vmem:[%s6452_s3 + $0x5c] sm:$0xf0] }
 0x5e9   : > { %v3948_v49 = vor.u32 %v4683_v42, %v3945_v43  ;;  %v4676_v58 = vld [vmem:[%s6452_s3 + $0x2e4] sm:$0xf0]  ;;  %v3625_v42 = vld [vmem:[%s6452_s3 + $0xe0] sm:$0xf0] }
 0x5ea   : > { %1905 = vmatpush.bf16.msra.mxu0 %v3616_v60  ;;  %v3889_v60 = vld [vmem:[%s6452_s3 + $0x2e8] sm:$0xf0]  ;;  %v3888_v3 = vor.u32 %v4676_v58, %v3887_v57  ;;  %v3631_v43 = vld [vmem:[%s6452_s3 + $0xa8] sm:$0xf]  ;;  %v4587_v51 = vld [vmem:[%s6452_s3 + $0x24] sm:$0xf] }
 0x5eb   : > { %1918 = vmatpush.bf16.msrb.mxu1 %v3620_v1  ;;  %v3815_v1 = vld [vmem:[%s6452_s3 + $0x220] sm:$0xf]  ;;  %v4596_v57 = vld [vmem:[%s6452_s3 + $0x64] sm:$0xf0]  ;;  %v4588_v58 = vld [vmem:[%s6452_s3 + $0x2c] sm:$0xf] }
 0x5ec   : > { %1888 = vmatpush.bf16.msrb.mxu3 %v3868_v10  ;;  %1879 = vmatpush.bf16.msra.mxu2 %v3608_v55  ;;  %v4586_v10 = vld [vmem:[%s6452_s3 + $0x1c] sm:$0xf]  ;;  %v4667_v55 = vld [vmem:[%s6452_s3 + $0x2a4] sm:$0xf] }
 0x5ed   : > { %v3556_v12 = vor.u32 %v4586_v10, %v3553_v11  ;;  %v3884_v0 = vor.u32 %v4667_v55, %v3881_v56  ;;  %v3816_v10 = vor.u32 %v4659_v2, %v3815_v1  ;;  %v3567_v56 = vld [vmem:[%s6452_s3 + $0x28] sm:$0xf]  ;;  %v4025_v1 = vld [vmem:[%s6452_s3 + $0x3f0] sm:$0xf0]  ;;  %v4031_v2 = vld [vmem:[%s6452_s3 + $0x3b8] sm:$0xf] }
 0x5ee   : > { %1906 = vmatpush.bf16.msra.mxu0 %v3552_v9  ;;  %v3825_v9 = vld [vmem:[%s6452_s3 + $0x268] sm:$0xf0] }
 0x5ef   : > { %1919 = vmatpush.bf16.msrb.mxu1 %v3556_v12  ;;  %v3751_v12 = vld [vmem:[%s6452_s3 + $0x1a0] sm:$0xf] }
 0x5f0   : > { %1889 = vmatpush.bf16.msrb.mxu3 %v3804_v23  ;;  %1880 = vmatpush.bf16.msra.mxu2 %v3544_v4  ;;  %v4852_v23 = vld [vmem:[%s6458_s9] ss:$0 sm:$0xff]  ;;  %v4651_v4 = vld [vmem:[%s6452_s3 + $0x224] sm:$0xf] }
 0x5f1   : > { %v3820_v11 = vor.u32 %v4651_v4, %v3817_v5  ;;  %v4710_v4 = vld [vmem:[%s6452_s3 + $0x3f4] sm:$0xf0]  ;;  %v4702_v5 = vld [vmem:[%s6452_s3 + $0x3bc] sm:$0xf] }
 0x5f4   : > { %1890 = vmatpush.bf16.msrb.mxu3 %v3740_v34  ;;  %v4017_v34 = vld [vmem:[%s6452_s3 + $0x3e8] sm:$0xf0] }
 0x5f5   : > { %v4020_v41 = vor.u32 %v4700_v33, %v4017_v34  ;;  %v3697_v33 = vld [vmem:[%s6452_s3 + $0x168] sm:$0xf0] }
 0x5f8   : > { %1891 = vmatpush.bf16.msrb.mxu3 %v3676_v46  ;;  %v4684_v46 = vld [vmem:[%s6452_s3 + $0x32c] sm:$0xf] }
 0x5f9   : > { %v3956_v54 = vor.u32 %v4684_v46, %v3953_v47  ;;  %v3633_v46 = vld [vmem:[%s6452_s3 + $0xe8] sm:$0xf0]  ;;  %v3559_v47 = vld [vmem:[%s6452_s3 + $0x20] sm:$0xf] }
 0x5fa   : > { %v3636_v55 = vor.u32 %v4604_v45, %v3633_v46  ;;  %v3841_v45 = vld [vmem:[%s6452_s3 + $0x278] sm:$0xf0] }
 0x5fc   : > { %1892 = vmatpush.bf16.msrb.mxu3 %v3612_v59  ;;  %v4668_v59 = vld [vmem:[%s6452_s3 + $0x2ac] sm:$0xf] }
 0x5fd   : > { %v3892_v62 = vor.u32 %v4668_v59, %v3889_v60  ;;  %v3569_v59 = vld [vmem:[%s6452_s3 + $0x68] sm:$0xf0]  ;;  %v4023_v60 = vld [vmem:[%s6452_s3 + $0x3b0] sm:$0xf] }
 0x600   : > { %1893 = vmatpush.bf16.msrb.mxu3 %v3548_v8  ;;  %v4652_v8 = vld [vmem:[%s6452_s3 + $0x22c] sm:$0xf] }
 0x654   : > { %v994_v13 = vpop.xlane.xlu0 %993 }
 0x655   : > { %v995_v14 = vmul.f32 %v994_v13, %v5381_v22  ;;  %v4643_v13 = vld [vmem:[%s6452_s3 + $0x1dc] sm:$0xf0] }
 0x657   : > { %v996_v15 = vadd.f32 1e-05, %v995_v14  ;;  %v3824_v14 = vor.u32 %v4660_v7, %v3823_v6  ;;  %v4033_v6 = vld [vmem:[%s6452_s3 + $0x3f8] sm:$0xf0]  ;;  %v3568_v7 = vor.u32 %v4596_v57, %v3567_v56  ;;  %v4646_v56 = vld [vmem:[%s6452_s3 + $0x1f4] sm:$0xf0] }
 0x658   : > { %v4638_v57 = vld [vmem:[%s6452_s3 + $0x1bc] sm:$0xf] }
 0x659   : > { %4875 = vrsqrt.f32 %v996_v15  ;;  %vm1003_vm7 = vweird.f32 %v996_v15 }
 0x65f   : > { %v4876_v16 = vpop.eup %4875 }
 0x660   : > { %v998_v17 = vmul.f32 %v4876_v16, %v996_v15  ;;  %vm1004_vm6 = vweird.f32 %v4876_v16  ;;  %v3828_v15 = vor.u32 %v4652_v8, %v3825_v9  ;;  %v3572_v8 = vor.u32 %v4588_v58, %v3569_v59  ;;  %v3777_v58 = vld [vmem:[%s6452_s3 + $0x1f8] sm:$0xf0] }
 0x661   : > { %vm1005_vm8 = vmor %vm1003_vm7, %vm1004_vm6 }
 0x662   : > { %v999_v18 = vmul.f32 %v4876_v16, %v998_v17  ;;  %v3753_v17 = vld [vmem:[%s6452_s3 + $0x1e0] sm:$0xf0] }
 0x664   : > { %v1000_v19 = vmul.f32 0.5, %v999_v18  ;;  %v3759_v18 = vld [vmem:[%s6452_s3 + $0x1a8] sm:$0xf] }
 0x666   : > { %v1001_v20 = vsub.f32 1.5, %v1000_v19  ;;  %v4644_v19 = vld [vmem:[%s6452_s3 + $0x1e4] sm:$0xf0] }
 0x668   : > { %v1002_v21 = vmul.f32 %v4876_v16, %v1001_v20  ;;  %v4636_v20 = vld [vmem:[%s6452_s3 + $0x1ac] sm:$0xf] }
 0x66a   : > { %v1006_v24 = vsel %vm1005_vm8, %v4876_v16, %v1002_v21  ;;  %v4635_v16 = vld [vmem:[%s6452_s3 + $0x1a4] sm:$0xf]  ;;  %v3761_v21 = vld [vmem:[%s6452_s3 + $0x1e8] sm:$0xf0] }
 0x66b   : > { %v1007_v26 = vmul.f32 %v1006_v24, %v5385_v29  ;;  %v4015_v29 = vld [vmem:[%s6452_s3 + $0x3a8] sm:$0xf]  ;;  %v3756_v24 = vor.u32 %v4635_v16, %v3753_v17  ;;  %v3764_v28 = vor.u32 %v4636_v20, %v3761_v21  ;;  %v3961_v16 = vld [vmem:[%s6452_s3 + $0x370] sm:$0xf0]  ;;  %v3967_v17 = vld [vmem:[%s6452_s3 + $0x338] sm:$0xf] }
 0x66c   : > { %v4016_v40 = vor.u32 %v4708_v32, %v4015_v29  ;;  %v4628_v29 = vld [vmem:[%s6452_s3 + $0x164] sm:$0xf0]  ;;  %v4620_v32 = vld [vmem:[%s6452_s3 + $0x12c] sm:$0xf]  ;;  %v3969_v20 = vld [vmem:[%s6452_s3 + $0x378] sm:$0xf0] }
 0x66d   : > { %v1011_v27 = vmul.f32 %v4852_v23, %v1007_v26  ;;  %v3752_v23 = vor.u32 %v4643_v13, %v3751_v12  ;;  %v4627_v26 = vld [vmem:[%s6452_s3 + $0x15c] sm:$0xf0]  ;;  %v3696_v39 = vor.u32 %v4628_v29, %v3695_v31  ;;  %v4693_v12 = vld [vmem:[%s6452_s3 + $0x36c] sm:$0xf0]  ;;  %v4032_v13 = vor.u32 %v4710_v4, %v4031_v2  ;;  %v4678_v31 = vld [vmem:[%s6452_s3 + $0x2f4] sm:$0xf0] }
 0x66e   : > { %v4670_v29 = vld [vmem:[%s6452_s3 + $0x2bc] sm:$0xf]  ;;  %v3780_v2 = vor.u32 %v4638_v57, %v3777_v58  ;;  %v3711_v4 = vld [vmem:[%s6452_s3 + $0x138] sm:$0xf]  ;;  %v4729_v57 = vld [vmem:[%s6453_s4 + $0x90] sm:$0xff] }
 0x66f   : > { %v5628_v61 = vadd.f32 %v4853_v25, %v1011_v27  ;;  %v3687_v25 = vld [vmem:[%s6452_s3 + $0x120] sm:$0xf]  ;;  %v3760_v27 = vor.u32 %v4644_v19, %v3759_v18  ;;  %v4694_v18 = vld [vmem:[%s6452_s3 + $0x374] sm:$0xf0]  ;;  %v4686_v19 = vld [vmem:[%s6452_s3 + $0x33c] sm:$0xf] }
 0x670   : > { %v3688_v34 = vor.u32 %v4627_v26, %v3687_v25  ;;  %v4677_v25 = vld [vmem:[%s6452_s3 + $0x2ec] sm:$0xf0]  ;;  %v3968_v26 = vor.u32 %v4694_v18, %v3967_v17  ;;  %v4614_v17 = vld [vmem:[%s6452_s3 + $0xf4] sm:$0xf0]  ;;  %v4606_v18 = vld [vmem:[%s6452_s3 + $0xbc] sm:$0xf] }
 0x671   : > { %v5641_v35 = vpack.c.bf16 %v5628_v61, %v5628_v61  ;;  %v4737_v58 = vld [vmem:[%s6453_s4 + $0xd0] sm:$0xff] }
 0x673   : > { %1829 = vmatmul.bf16.vlgmr.msrb.gmra.mxu2 %v5641_v35  ;;  %1842 = vmatmul.bf16.vlgmr.msra.gmra.mxu3 %v5641_v35 }
 0x674   : > { %1855 = vmatmul.bf16.vlgmr.msrb.gmra.mxu0 %v5641_v35  ;;  %1868 = vmatmul.bf16.vlgmr.msra.gmra.mxu1 %v5641_v35 }
 0x675   : > { %1925 = vmatpush.bf16.msrb.mxu2 %v4008_v36  ;;  %1938 = vmatpush.bf16.msra.mxu3 %v4012_v37  ;;  %v3692_v36 = vor.u32 %v4619_v53, %v3689_v30  ;;  %v3623_v37 = vld [vmem:[%s6452_s3 + $0xa0] sm:$0xf]  ;;  %v3897_v53 = vld [vmem:[%s6452_s3 + $0x2f0] sm:$0xf0]  ;;  %v3903_v30 = vld [vmem:[%s6452_s3 + $0x2b8] sm:$0xf] }
 0x676   : > { %1951 = vmatpush.bf16.msrb.mxu0 %v4016_v40  ;;  %1964 = vmatpush.bf16.msra.mxu1 %v4020_v41  ;;  %v3700_v40 = vor.u32 %v4620_v32, %v3697_v33  ;;  %v4603_v41 = vld [vmem:[%s6452_s3 + $0xa4] sm:$0xf]  ;;  %v3905_v32 = vld [vmem:[%s6452_s3 + $0x2f8] sm:$0xf0] }
 0x679   : > { %1926 = vmatpush.bf16.msrb.mxu2 %v3944_v48  ;;  %1939 = vmatpush.bf16.msra.mxu3 %v3948_v49  ;;  %v3624_v48 = vor.u32 %v4611_v38, %v3623_v37  ;;  %v3628_v49 = vor.u32 %v4603_v41, %v3625_v42  ;;  %v4661_v37 = vld [vmem:[%s6452_s3 + $0x26c] sm:$0xf0]  ;;  %v3904_v38 = vor.u32 %v4678_v31, %v3903_v30  ;;  %v3833_v41 = vld [vmem:[%s6452_s3 + $0x270] sm:$0xf0]  ;;  %v3839_v42 = vld [vmem:[%s6452_s3 + $0x238] sm:$0xf] }
 0x67a   : > { %1952 = vmatpush.bf16.msrb.mxu0 %v3952_v52  ;;  %1965 = vmatpush.bf16.msra.mxu1 %v3956_v54  ;;  %v3561_v52 = vld [vmem:[%s6452_s3 + $0x60] sm:$0xf0]  ;;  %v3632_v54 = vor.u32 %v4612_v44, %v3631_v43  ;;  %v4662_v43 = vld [vmem:[%s6452_s3 + $0x274] sm:$0xf0]  ;;  %v4654_v44 = vld [vmem:[%s6452_s3 + $0x23c] sm:$0xf] }
 0x67b   : > { %v4598_v30 = vld [vmem:[%s6452_s3 + $0x74] sm:$0xf0]  ;;  %v4590_v31 = vld [vmem:[%s6452_s3 + $0x3c] sm:$0xf] }
 0x67d   : > { %1927 = vmatpush.bf16.msrb.mxu2 %v3880_v63  ;;  %1940 = vmatpush.bf16.msra.mxu3 %v3884_v0  ;;  %v4709_v63 = vld [vmem:[%s6452_s3 + $0x3ec] sm:$0xf0]  ;;  %v4701_v0 = vld [vmem:[%s6452_s3 + $0x3b4] sm:$0xf] }
 0x67e   : > { %1953 = vmatpush.bf16.msrb.mxu0 %v3888_v3  ;;  %1966 = vmatpush.bf16.msra.mxu1 %v3892_v62  ;;  %v3560_v3 = vor.u32 %v4595_v50, %v3559_v47  ;;  %v3564_v62 = vor.u32 %v4587_v51, %v3561_v52  ;;  %v4024_v9 = vor.u32 %v4709_v63, %v4023_v60  ;;  %v4637_v52 = vld [vmem:[%s6452_s3 + $0x1b4] sm:$0xf]  ;;  %v3703_v63 = vld [vmem:[%s6452_s3 + $0x130] sm:$0xf] }
 0x67f   : > { %v3840_v50 = vor.u32 %v4662_v43, %v3839_v42  ;;  %v3844_v51 = vor.u32 %v4654_v44, %v3841_v45  ;;  %v4741_v42 = vld [vmem:[%s6453_s4 + $0xf0] sm:$0xff]  ;;  %v4732_v45 = vld [vmem:[%s6453_s4 + $0xa8] sm:$0xff] }
 0x680   : > { %v4717_v43 = vld [vmem:[%s6453_s4 + $0x30] sm:$0xff] }
 0x681   : > { %1928 = vmatpush.bf16.msrb.mxu2 %v3816_v10  ;;  %1941 = vmatpush.bf16.msra.mxu3 %v3820_v11  ;;  %v4028_v10 = vor.u32 %v4701_v0, %v4025_v1  ;;  %v3959_v11 = vld [vmem:[%s6452_s3 + $0x330] sm:$0xf] }
 0x682   : > { %1954 = vmatpush.bf16.msrb.mxu0 %v3824_v14  ;;  %1967 = vmatpush.bf16.msra.mxu1 %v3828_v15  ;;  %v4036_v14 = vor.u32 %v4702_v5, %v4033_v6  ;;  %v4685_v15 = vld [vmem:[%s6452_s3 + $0x334] sm:$0xf]  ;;  %v3960_v21 = vor.u32 %v4693_v12, %v3959_v11  ;;  %v4629_v0 = vld [vmem:[%s6452_s3 + $0x16c] sm:$0xf0]  ;;  %v4630_v5 = vld [vmem:[%s6452_s3 + $0x174] sm:$0xf0] }
 0x683   : > { %1881 = vmatmul.bf16.vlgmr.msra.gmra.mxu2 %v5641_v35  ;;  %1894 = vmatmul.bf16.vlgmr.msrb.gmra.mxu3 %v5641_v35  ;;  %v4622_v6 = vld [vmem:[%s6452_s3 + $0x13c] sm:$0xf]  ;;  %v4613_v11 = vld [vmem:[%s6452_s3 + $0xec] sm:$0xf0]  ;;  %v3712_v12 = vor.u32 %v4630_v5, %v3711_v4 }
 0x684   : > { %1907 = vmatmul.bf16.vlgmr.msra.gmra.mxu0 %v5641_v35  ;;  %1920 = vmatmul.bf16.vlgmr.msrb.gmra.mxu1 %v5641_v35  ;;  %v4725_v44 = vld [vmem:[%s6453_s4 + $0x70] sm:$0xff]  ;;  %v4766_v4 = vld [vmem:[%s6453_s4 + $0x1b8] sm:$0xff] }
 0x685   : > { %1929 = vmatpush.bf16.msrb.mxu2 %v3752_v23  ;;  %1942 = vmatpush.bf16.msra.mxu3 %v3756_v24  ;;  %v3964_v23 = vor.u32 %v4685_v15, %v3961_v16  ;;  %v3895_v24 = vld [vmem:[%s6452_s3 + $0x2b0] sm:$0xf]  ;;  %v3641_v15 = vld [vmem:[%s6452_s3 + $0xf0] sm:$0xf0]  ;;  %v3647_v16 = vld [vmem:[%s6452_s3 + $0xb8] sm:$0xf] }
 0x686   : > { %1955 = vmatpush.bf16.msrb.mxu0 %v3760_v27  ;;  %1968 = vmatpush.bf16.msra.mxu1 %v3764_v28  ;;  %v3972_v27 = vor.u32 %v4686_v19, %v3969_v20  ;;  %v4669_v28 = vld [vmem:[%s6452_s3 + $0x2b4] sm:$0xf]  ;;  %v3896_v33 = vor.u32 %v4677_v25, %v3895_v24  ;;  %v3649_v19 = vld [vmem:[%s6452_s3 + $0xf8] sm:$0xf0]  ;;  %v4597_v24 = vld [vmem:[%s6452_s3 + $0x6c] sm:$0xf0]  ;;  %v3648_v25 = vor.u32 %v4614_v17, %v3647_v16 }
 0x687   : > { %v4774_v5 = vld [vmem:[%s6453_s4 + $0x1f8] sm:$0xff]  ;;  %v4748_v16 = vld [vmem:[%s6453_s4 + $0x128] sm:$0xff] }
 0x688   : > { %v4756_v17 = vld [vmem:[%s6453_s4 + $0x168] sm:$0xff] }
 0x689   : > { %1930 = vmatpush.bf16.msrb.mxu2 %v3688_v34  ;;  %1943 = vmatpush.bf16.msra.mxu3 %v3692_v36  ;;  %v3900_v34 = vor.u32 %v4669_v28, %v3897_v53  ;;  %v3831_v36 = vld [vmem:[%s6452_s3 + $0x230] sm:$0xf]  ;;  %v3577_v28 = vld [vmem:[%s6452_s3 + $0x70] sm:$0xf0]  ;;  %v3583_v53 = vld [vmem:[%s6452_s3 + $0x38] sm:$0xf] }
 0x68a   : > { %1956 = vmatpush.bf16.msrb.mxu0 %v3696_v39  ;;  %1969 = vmatpush.bf16.msra.mxu1 %v3700_v40  ;;  %v3908_v39 = vor.u32 %v4670_v29, %v3905_v32  ;;  %v4653_v40 = vld [vmem:[%s6452_s3 + $0x234] sm:$0xf]  ;;  %v3832_v46 = vor.u32 %v4661_v37, %v3831_v36  ;;  %v3585_v29 = vld [vmem:[%s6452_s3 + $0x78] sm:$0xf0] }
 0x68b   : > { %v3836_v47 = vor.u32 %v4653_v40, %v3833_v41  ;;  %v3588_v36 = vor.u32 %v4590_v31, %v3585_v29  ;;  %v4734_v37 = vld [vmem:[%s6453_s4 + $0xb8] sm:$0xff]  ;;  %v4733_v41 = vld [vmem:[%s6453_s4 + $0xb0] sm:$0xff]  ;;  %v4760_v31 = vld [vmem:[%s6453_s4 + $0x188] sm:$0xff] }
 0x68c   : > { %v4726_v40 = vld [vmem:[%s6453_s4 + $0x78] sm:$0xff]  ;;  %v4768_v29 = vld [vmem:[%s6453_s4 + $0x1c8] sm:$0xff] }
 0x68d   : > { %1931 = vmatpush.bf16.msrb.mxu2 %v3624_v48  ;;  %1944 = vmatpush.bf16.msra.mxu3 %v3628_v49  ;;  %v3767_v48 = vld [vmem:[%s6452_s3 + $0x1b0] sm:$0xf] }
 0x68e   : > { %1957 = vmatpush.bf16.msrb.mxu0 %v3632_v54  ;;  %1970 = vmatpush.bf16.msra.mxu1 %v3636_v55  ;;  %v4645_v49 = vld [vmem:[%s6452_s3 + $0x1ec] sm:$0xf0]  ;;  %v3769_v54 = vld [vmem:[%s6452_s3 + $0x1f0] sm:$0xf0]  ;;  %v3775_v55 = vld [vmem:[%s6452_s3 + $0x1b8] sm:$0xf] }
 0x68f   : > { %v3768_v59 = vor.u32 %v4645_v49, %v3767_v48  ;;  %v3772_v60 = vor.u32 %v4637_v52, %v3769_v54  ;;  %v3776_v1 = vor.u32 %v4646_v56, %v3775_v55  ;;  %v4731_v48 = vld [vmem:[%s6453_s4 + $0xa0] sm:$0xff]  ;;  %v4730_v52 = vld [vmem:[%s6453_s4 + $0x98] sm:$0xff] }
 0x690   : > { %v4739_v49 = vld [vmem:[%s6453_s4 + $0xe0] sm:$0xff]  ;;  %v4738_v54 = vld [vmem:[%s6453_s4 + $0xd8] sm:$0xff] }
 0x691   : > { %1932 = vmatpush.bf16.msrb.mxu2 %v3560_v3  ;;  %1945 = vmatpush.bf16.msra.mxu3 %v3564_v62  ;;  %v4621_v3 = vld [vmem:[%s6452_s3 + $0x134] sm:$0xf]  ;;  %v4714_v55 = vld [vmem:[%s6453_s4 + $0x18] sm:$0xff] }
 0x692   : > { %1958 = vmatpush.bf16.msrb.mxu0 %v3568_v7  ;;  %1971 = vmatpush.bf16.msra.mxu1 %v3572_v8  ;;  %v3705_v62 = vld [vmem:[%s6452_s3 + $0x170] sm:$0xf0]  ;;  %v3713_v7 = vld [vmem:[%s6452_s3 + $0x178] sm:$0xf0]  ;;  %v3704_v8 = vor.u32 %v4629_v0, %v3703_v63  ;;  %v4728_v63 = vld [vmem:[%s6453_s4 + $0x88] sm:$0xff] }
 0x693   : > { %v4722_v56 = vld [vmem:[%s6453_s4 + $0x58] sm:$0xff]  ;;  %v4736_v0 = vld [vmem:[%s6453_s4 + $0xc8] sm:$0xff] }
 0x694   : > { %1933 = vmatmul.bf16.vlgmr.msrb.gmra.mxu2 %v5641_v35  ;;  %1946 = vmatmul.bf16.vlgmr.msra.gmra.mxu3 %v5641_v35 }
 0x695   : > { %1977 = vmatpush.bf16.msra.mxu2 %v4024_v9  ;;  %1990 = vmatpush.bf16.msrb.mxu3 %v4028_v10  ;;  %v3708_v9 = vor.u32 %v4621_v3, %v3705_v62  ;;  %v3639_v10 = vld [vmem:[%s6452_s3 + $0xb0] sm:$0xf]  ;;  %v4727_v3 = vld [vmem:[%s6453_s4 + $0x80] sm:$0xff] }
 0x696   : > { %2003 = vmatpush.bf16.msra.mxu0 %v4032_v13  ;;  %2016 = vmatpush.bf16.msrb.mxu1 %v4036_v14  ;;  %v3716_v13 = vor.u32 %v4622_v6, %v3713_v7  ;;  %v4605_v14 = vld [vmem:[%s6452_s3 + $0xb4] sm:$0xf]  ;;  %v3640_v20 = vor.u32 %v4613_v11, %v3639_v10  ;;  %v4735_v62 = vld [vmem:[%s6453_s4 + $0xc0] sm:$0xff] }
 0x697   : > { %1959 = vmatmul.bf16.vlgmr.msrb.gmra.mxu0 %v5641_v35  ;;  %1972 = vmatmul.bf16.vlgmr.msra.gmra.mxu1 %v5641_v35  ;;  %v4711_v6 = vld [vmem:[%s6453_s4] sm:$0xff]  ;;  %v4765_v10 = vld [vmem:[%s6453_s4 + $0x1b0] sm:$0xff] }
 0x698   : > { %v4719_v7 = vld [vmem:[%s6453_s4 + $0x40] sm:$0xff]  ;;  %v4773_v11 = vld [vmem:[%s6453_s4 + $0x1f0] sm:$0xff] }
 0x699   : > { %1978 = vmatpush.bf16.msra.mxu2 %v3960_v21  ;;  %1991 = vmatpush.bf16.msrb.mxu3 %v3964_v23  ;;  %v3644_v21 = vor.u32 %v4605_v14, %v3641_v15  ;;  %v3575_v23 = vld [vmem:[%s6452_s3 + $0x30] sm:$0xf]  ;;  %v4764_v14 = vld [vmem:[%s6453_s4 + $0x1a8] sm:$0xff] }
 0x69a   : > { %2004 = vmatpush.bf16.msra.mxu0 %v3968_v26  ;;  %2017 = vmatpush.bf16.msrb.mxu1 %v3972_v27  ;;  %v3652_v26 = vor.u32 %v4606_v18, %v3649_v19  ;;  %v4589_v27 = vld [vmem:[%s6452_s3 + $0x34] sm:$0xf]  ;;  %v3576_v32 = vor.u32 %v4597_v24, %v3575_v23  ;;  %v4772_v15 = vld [vmem:[%s6453_s4 + $0x1e8] sm:$0xff]  ;;  %v4763_v18 = vld [vmem:[%s6453_s4 + $0x1a0] sm:$0xff] }
 0x69b   : > { %v4771_v19 = vld [vmem:[%s6453_s4 + $0x1e0] sm:$0xff]  ;;  %v4762_v23 = vld [vmem:[%s6453_s4 + $0x198] sm:$0xff] }
 0x69c   : > { %v4770_v24 = vld [vmem:[%s6453_s4 + $0x1d8] sm:$0xff] }
 0x69d   : > { %1979 = vmatpush.bf16.msra.mxu2 %v3896_v33  ;;  %1992 = vmatpush.bf16.msrb.mxu3 %v3900_v34  ;;  %v3580_v33 = vor.u32 %v4589_v27, %v3577_v28  ;;  %v3584_v34 = vor.u32 %v4598_v30, %v3583_v53  ;;  %v4761_v27 = vld [vmem:[%s6453_s4 + $0x190] sm:$0xff] }
 0x69e   : > { %2005 = vmatpush.bf16.msra.mxu0 %v3904_v38  ;;  %2018 = vmatpush.bf16.msrb.mxu1 %v3908_v39  ;;  %v4742_v38 = vld [vmem:[%s6453_s4 + $0xf8] sm:$0xff]  ;;  %v4769_v28 = vld [vmem:[%s6453_s4 + $0x1d0] sm:$0xff] }
 0x69f   : > { %v4718_v39 = vld [vmem:[%s6453_s4 + $0x38] sm:$0xff]  ;;  %v4745_v53 = vld [vmem:[%s6453_s4 + $0x110] sm:$0xff] }
 0x6a0   : > { %v4753_v30 = vld [vmem:[%s6453_s4 + $0x150] sm:$0xff] }
 0x6a1   : > { %1980 = vmatpush.bf16.msra.mxu2 %v3832_v46  ;;  %1993 = vmatpush.bf16.msrb.mxu3 %v3836_v47  ;;  %v4716_v46 = vld [vmem:[%s6453_s4 + $0x28] sm:$0xff] }
 0x6a2   : > { %2006 = vmatpush.bf16.msra.mxu0 %v3840_v50  ;;  %2019 = vmatpush.bf16.msrb.mxu1 %v3844_v51  ;;  %v4724_v47 = vld [vmem:[%s6453_s4 + $0x68] sm:$0xff]  ;;  %v4715_v50 = vld [vmem:[%s6453_s4 + $0x20] sm:$0xff] }
 0x6a3   : > { %v4723_v51 = vld [vmem:[%s6453_s4 + $0x60] sm:$0xff] }
 0x6a5   : > { %1981 = vmatpush.bf16.msra.mxu2 %v3768_v59  ;;  %1994 = vmatpush.bf16.msrb.mxu3 %v3772_v60  ;;  %v4713_v59 = vld [vmem:[%s6453_s4 + $0x10] sm:$0xff] }
 0x6a6   : > { %2007 = vmatpush.bf16.msra.mxu0 %v3776_v1  ;;  %2020 = vmatpush.bf16.msrb.mxu1 %v3780_v2  ;;  %v4721_v60 = vld [vmem:[%s6453_s4 + $0x50] sm:$0xff]  ;;  %v4712_v1 = vld [vmem:[%s6453_s4 + $0x8] sm:$0xff] }
 0x6a7   : > { %v4720_v2 = vld [vmem:[%s6453_s4 + $0x48] sm:$0xff] }
 0x6a9   : > { %1982 = vmatpush.bf16.msra.mxu2 %v3704_v8  ;;  %1995 = vmatpush.bf16.msrb.mxu3 %v3708_v9  ;;  %v4750_v8 = vld [vmem:[%s6453_s4 + $0x138] sm:$0xff] }
 0x6aa   : > { %2008 = vmatpush.bf16.msra.mxu0 %v3712_v12  ;;  %2021 = vmatpush.bf16.msrb.mxu1 %v3716_v13  ;;  %v4758_v9 = vld [vmem:[%s6453_s4 + $0x178] sm:$0xff]  ;;  %v4749_v12 = vld [vmem:[%s6453_s4 + $0x130] sm:$0xff] }
 0x6ab   : > { %v4757_v13 = vld [vmem:[%s6453_s4 + $0x170] sm:$0xff] }
 0x6ad   : > { %1983 = vmatpush.bf16.msra.mxu2 %v3640_v20  ;;  %1996 = vmatpush.bf16.msrb.mxu3 %v3644_v21  ;;  %v4747_v20 = vld [vmem:[%s6453_s4 + $0x120] sm:$0xff] }
 0x6ae   : > { %2009 = vmatpush.bf16.msra.mxu0 %v3648_v25  ;;  %2022 = vmatpush.bf16.msrb.mxu1 %v3652_v26  ;;  %v4755_v21 = vld [vmem:[%s6453_s4 + $0x160] sm:$0xff]  ;;  %v4746_v25 = vld [vmem:[%s6453_s4 + $0x118] sm:$0xff] }
 0x6af   : > { %v4754_v26 = vld [vmem:[%s6453_s4 + $0x158] sm:$0xff] }
 0x6b1   : > { %1984 = vmatpush.bf16.msra.mxu2 %v3576_v32  ;;  %1997 = vmatpush.bf16.msrb.mxu3 %v3580_v33  ;;  %v4744_v32 = vld [vmem:[%s6453_s4 + $0x108] sm:$0xff] }
 0x6b2   : > { %2010 = vmatpush.bf16.msra.mxu0 %v3584_v34  ;;  %2023 = vmatpush.bf16.msrb.mxu1 %v3588_v36  ;;  %v4752_v33 = vld [vmem:[%s6453_s4 + $0x148] sm:$0xff]  ;;  %v4759_v34 = vld [vmem:[%s6453_s4 + $0x180] sm:$0xff] }
 0x6b3   : > { %v4767_v36 = vld [vmem:[%s6453_s4 + $0x1c0] sm:$0xff] }
 0x6b4   : > { %1985 = vmatmul.bf16.vlgmr.msra.gmra.mxu2 %v5641_v35  ;;  %1998 = vmatmul.bf16.vlgmr.msrb.gmra.mxu3 %v5641_v35 }
 0x6b5   : > { %2011 = vmatmul.bf16.vlgmr.msra.gmra.mxu0 %v5641_v35  ;;  %2024 = vmatmul.bf16.vlgmr.msrb.gmra.mxu1 %v5641_v35  ;;  %v4740_v35 = vld [vmem:[%s6453_s4 + $0xe8] sm:$0xff] }
 0x6b6   : > { %3115 = vmatpush.bf16.msrb.mxu0 %v4734_v37  ;;  %3128 = vmatpush.bf16.msra.mxu1 %v4742_v38  ;;  %v4743_v37 = vld [vmem:[%s6453_s4 + $0x100] sm:$0xff] }
 0x6b7   : > { %3089 = vmatpush.bf16.msrb.mxu2 %v4718_v39  ;;  %3102 = vmatpush.bf16.msra.mxu3 %v4726_v40  ;;  %v4751_v38 = vld [vmem:[%s6453_s4 + $0x140] sm:$0xff] }
 0x6b8   : > { %v6214_v39 = vld [vmem:[%s6456_s7] sm:$0xff] }
 0x6b9   : > { %v1151_v40 = vperm.slane %v6214_v39, 2 }
 0x6ba   : > { %3116 = vmatpush.bf16.msrb.mxu0 %v4733_v41  ;;  %3129 = vmatpush.bf16.msra.mxu1 %v4741_v42  ;;  %v1152_v41 = vperm.slane %v6214_v39, 3 }
 0x6bb   : > { %3090 = vmatpush.bf16.msrb.mxu2 %v4717_v43  ;;  %3103 = vmatpush.bf16.msra.mxu3 %v4725_v44 }
 0x6be   : > { %3117 = vmatpush.bf16.msrb.mxu0 %v4732_v45  ;;  %3130 = vmatpush.bf16.msra.mxu1 %v4740_v35  ;;  %v1149_v35 = vperm.slane %v6214_v39, 0 }
 0x6bf   : > { %3091 = vmatpush.bf16.msrb.mxu2 %v4716_v46  ;;  %3104 = vmatpush.bf16.msra.mxu3 %v4724_v47  ;;  %v1150_v46 = vperm.slane %v6214_v39, 1 }
 0x6c2   : > { %3118 = vmatpush.bf16.msrb.mxu0 %v4731_v48  ;;  %3131 = vmatpush.bf16.msra.mxu1 %v4739_v49  ;;  %v4798_v49 = vld [vmem:[%s6453_s4 + $0x2b8] sm:$0xff] }
 0x6c3   : > { %3092 = vmatpush.bf16.msrb.mxu2 %v4715_v50  ;;  %3105 = vmatpush.bf16.msra.mxu3 %v4723_v51  ;;  %v4806_v50 = vld [vmem:[%s6453_s4 + $0x2f8] sm:$0xff] }
 0x6c6   : > { %3119 = vmatpush.bf16.msrb.mxu0 %v4730_v52  ;;  %3132 = vmatpush.bf16.msra.mxu1 %v4738_v54 }
 0x6c7   : > { %3093 = vmatpush.bf16.msrb.mxu2 %v4714_v55  ;;  %3106 = vmatpush.bf16.msra.mxu3 %v4722_v56 }
 0x6ca   : > { %3120 = vmatpush.bf16.msrb.mxu0 %v4729_v57  ;;  %3133 = vmatpush.bf16.msra.mxu1 %v4737_v58 }
 0x6cb   : > { %3094 = vmatpush.bf16.msrb.mxu2 %v4713_v59  ;;  %3107 = vmatpush.bf16.msra.mxu3 %v4721_v60 }
 0x6ce   : > { %3121 = vmatpush.bf16.msrb.mxu0 %v4728_v63  ;;  %3134 = vmatpush.bf16.msra.mxu1 %v4736_v0  ;;  %v4797_v0 = vld [vmem:[%s6453_s4 + $0x2b0] sm:$0xff] }
 0x6cf   : > { %3095 = vmatpush.bf16.msrb.mxu2 %v4712_v1  ;;  %3108 = vmatpush.bf16.msra.mxu3 %v4720_v2  ;;  %v4805_v1 = vld [vmem:[%s6453_s4 + $0x2f0] sm:$0xff] }
 0x6d2   : > { %3122 = vmatpush.bf16.msrb.mxu0 %v4727_v3  ;;  %3135 = vmatpush.bf16.msra.mxu1 %v4735_v62  ;;  %v4782_v62 = vld [vmem:[%s6453_s4 + $0x238] sm:$0xff] }
 0x6d3   : > { %3096 = vmatpush.bf16.msrb.mxu2 %v4711_v6  ;;  %3109 = vmatpush.bf16.msra.mxu3 %v4719_v7  ;;  %v4804_v6 = vld [vmem:[%s6453_s4 + $0x2e8] sm:$0xff] }
 0x6d6   : > { %3167 = vmatpush.bf16.msra.mxu0 %v4766_v4  ;;  %3180 = vmatpush.bf16.msrb.mxu1 %v4774_v5  ;;  %v4790_v4 = vld [vmem:[%s6453_s4 + $0x278] sm:$0xff]  ;;  %v4796_v5 = vld [vmem:[%s6453_s4 + $0x2a8] sm:$0xff] }
 0x6d7   : > { %3141 = vmatpush.bf16.msra.mxu2 %v4750_v8  ;;  %3154 = vmatpush.bf16.msrb.mxu3 %v4758_v9  ;;  %v1155_v9 = vperm.slane %v6214_v39, 6 }
 0x6da   : > { %3168 = vmatpush.bf16.msra.mxu0 %v4765_v10  ;;  %3181 = vmatpush.bf16.msrb.mxu1 %v4773_v11  ;;  %v1156_v10 = vperm.slane %v6214_v39, 7  ;;  %v4781_v11 = vld [vmem:[%s6453_s4 + $0x230] sm:$0xff] }
 0x6db   : > { %3142 = vmatpush.bf16.msra.mxu2 %v4749_v12  ;;  %3155 = vmatpush.bf16.msrb.mxu3 %v4757_v13  ;;  %v4789_v12 = vld [vmem:[%s6453_s4 + $0x270] sm:$0xff] }
 0x6de   : > { %3169 = vmatpush.bf16.msra.mxu0 %v4764_v14  ;;  %3182 = vmatpush.bf16.msrb.mxu1 %v4772_v15  ;;  %v4795_v15 = vld [vmem:[%s6453_s4 + $0x2a0] sm:$0xff] }
 0x6df   : > { %3143 = vmatpush.bf16.msra.mxu2 %v4748_v16  ;;  %3156 = vmatpush.bf16.msrb.mxu3 %v4756_v17  ;;  %v4803_v16 = vld [vmem:[%s6453_s4 + $0x2e0] sm:$0xff] }
 0x6e2   : > { %3170 = vmatpush.bf16.msra.mxu0 %v4763_v18  ;;  %3183 = vmatpush.bf16.msrb.mxu1 %v4771_v19  ;;  %v4780_v19 = vld [vmem:[%s6453_s4 + $0x228] sm:$0xff] }
 0x6e3   : > { %3144 = vmatpush.bf16.msra.mxu2 %v4747_v20  ;;  %3157 = vmatpush.bf16.msrb.mxu3 %v4755_v21  ;;  %v4788_v20 = vld [vmem:[%s6453_s4 + $0x268] sm:$0xff]  ;;  %v1153_v21 = vperm.slane %v6214_v39, 4 }
 0x6e6   : > { %3171 = vmatpush.bf16.msra.mxu0 %v4762_v23  ;;  %3184 = vmatpush.bf16.msrb.mxu1 %v4770_v24  ;;  %v1154_v23 = vperm.slane %v6214_v39, 5 }
 0x6e7   : > { %3145 = vmatpush.bf16.msra.mxu2 %v4746_v25  ;;  %3158 = vmatpush.bf16.msrb.mxu3 %v4754_v26  ;;  %v4794_v26 = vld [vmem:[%s6453_s4 + $0x298] sm:$0xff] }
 0x6ea   : > { %3172 = vmatpush.bf16.msra.mxu0 %v4761_v27  ;;  %3185 = vmatpush.bf16.msrb.mxu1 %v4769_v28  ;;  %v4802_v27 = vld [vmem:[%s6453_s4 + $0x2d8] sm:$0xff] }
 0x6eb   : > { %3146 = vmatpush.bf16.msra.mxu2 %v4745_v53  ;;  %3159 = vmatpush.bf16.msrb.mxu3 %v4753_v30 }
 0x6ee   : > { %3173 = vmatpush.bf16.msra.mxu0 %v4760_v31  ;;  %3186 = vmatpush.bf16.msrb.mxu1 %v4768_v29 }
 0x6ef   : > { %3147 = vmatpush.bf16.msra.mxu2 %v4744_v32  ;;  %3160 = vmatpush.bf16.msrb.mxu3 %v4752_v33  ;;  %v4779_v33 = vld [vmem:[%s6453_s4 + $0x220] sm:$0xff] }
 0x6f1   : > { %v1856_v42 = vpop.f32.mrf.mxu0  ;;  %v1869_v43 = vpop.f32.mrf.mxu1 }
 0x6f2   : > { %3174 = vmatpush.bf16.msra.mxu0 %v4759_v34  ;;  %3187 = vmatpush.bf16.msrb.mxu1 %v4767_v36  ;;  %v1857_v44 = vadd.f32 %v1856_v42, %v1151_v40  ;;  %v1870_v45 = vadd.f32 %v1869_v43, %v1152_v41  ;;  %v4787_v34 = vld [vmem:[%s6453_s4 + $0x260] sm:$0xff]  ;;  %v4793_v40 = vld [vmem:[%s6453_s4 + $0x290] sm:$0xff] }
 0x6f3   : > { %3148 = vmatpush.bf16.msra.mxu2 %v4743_v37  ;;  %3161 = vmatpush.bf16.msrb.mxu3 %v4751_v38  ;;  %v4801_v41 = vld [vmem:[%s6453_s4 + $0x2d0] sm:$0xff] }
 0x6f4   : > { %v2031_v47 = vmax.f32 %v1857_v44, 0.0  ;;  %v2032_v48 = vmax.f32 %v1870_v45, 0.0  ;;  %v4778_v44 = vld [vmem:[%s6453_s4 + $0x218] sm:$0xff] }
 0x6f5   : > { %v4786_v45 = vld [vmem:[%s6453_s4 + $0x258] sm:$0xff] }
 0x6f6   : > { %v2047_v51 = vpack.c.bf16 %v2031_v47, %v2031_v47  ;;  %v2048_v52 = vpack.c.bf16 %v2032_v48, %v2032_v48  ;;  %v1830_v54 = vpop.f32.mrf.mxu2  ;;  %v1843_v55 = vpop.f32.mrf.mxu3  ;;  %v6299_v47 = vld [vmem:[%s6456_s7 + $0x8] sm:$0xff] }
 0x6f7   : > { %v1831_v56 = vadd.f32 %v1830_v54, %v1149_v35  ;;  %v1844_v57 = vadd.f32 %v1843_v55, %v1150_v46  ;;  %v4792_v35 = vld [vmem:[%s6453_s4 + $0x288] sm:$0xff]  ;;  %v1160_v54 = vperm.slane %v6299_v47, 3  ;;  %v4791_v55 = vld [vmem:[%s6453_s4 + $0x280] sm:$0xff] }
 0x6f8   : > { %3123 = vmatmul.bf16.vlgmr.msrb.gmra.mxu0 %v2047_v51  ;;  %3136 = vmatmul.bf16.vlgmr.msra.gmra.mxu1 %v2048_v52  ;;  %v4800_v46 = vld [vmem:[%s6453_s4 + $0x2c8] sm:$0xff]  ;;  %v4785_v51 = vld [vmem:[%s6453_s4 + $0x250] sm:$0xff]  ;;  %v1159_v52 = vperm.slane %v6299_v47, 2 }
 0x6f9   : > { %v2029_v58 = vmax.f32 %v1831_v56, 0.0  ;;  %v2030_v59 = vmax.f32 %v1844_v57, 0.0  ;;  %3219 = vmatpush.bf16.msrb.mxu0 %v4798_v49  ;;  %3232 = vmatpush.bf16.msra.mxu1 %v4806_v50  ;;  %v1858_v60 = vpop.f32.mrf.mxu0  ;;  %v1871_v63 = vpop.f32.mrf.mxu1  ;;  %v4777_v50 = vld [vmem:[%s6453_s4 + $0x210] sm:$0xff]  ;;  %v4799_v56 = vld [vmem:[%s6453_s4 + $0x2c0] sm:$0xff]  ;;  %v4830_v57 = vld [vmem:[%s6453_s4 + $0x3b8] sm:$0xff] }
 0x6fa   : > { %v4776_v63 = vld [vmem:[%s6453_s4 + $0x208] sm:$0xff] }
 0x6fb   : > { %v2045_v2 = vpack.c.bf16 %v2029_v58, %v2029_v58  ;;  %v2046_v3 = vpack.c.bf16 %v2030_v59, %v2030_v59  ;;  %v4838_v58 = vld [vmem:[%s6453_s4 + $0x3f8] sm:$0xff] }
 0x6fd   : > { %3220 = vmatpush.bf16.msrb.mxu0 %v4797_v0  ;;  %3233 = vmatpush.bf16.msra.mxu1 %v4805_v1  ;;  %v4784_v0 = vld [vmem:[%s6453_s4 + $0x248] sm:$0xff] }
 0x6fe   : > { %3097 = vmatmul.bf16.vlgmr.msrb.gmra.mxu2 %v2045_v2  ;;  %3110 = vmatmul.bf16.vlgmr.msra.gmra.mxu3 %v2046_v3  ;;  %v1832_v7 = vpop.f32.mrf.mxu2  ;;  %v1845_v8 = vpop.f32.mrf.mxu3  ;;  %v1157_v3 = vperm.slane %v6299_v47, 0 }
 0x6ff   : > { %3193 = vmatpush.bf16.msrb.mxu2 %v4782_v62  ;;  %3206 = vmatpush.bf16.msra.mxu3 %v4790_v4  ;;  %v1158_v62 = vperm.slane %v6299_v47, 1  ;;  %v4837_v7 = vld [vmem:[%s6453_s4 + $0x3f0] sm:$0xff] }
 0x701   : > { %3221 = vmatpush.bf16.msrb.mxu0 %v4796_v5  ;;  %3234 = vmatpush.bf16.msra.mxu1 %v4804_v6  ;;  %v1908_v13 = vpop.f32.mrf.mxu0  ;;  %v1921_v14 = vpop.f32.mrf.mxu1  ;;  %v4829_v6 = vld [vmem:[%s6453_s4 + $0x3b0] sm:$0xff] }
 0x702   : > { %v1909_v17 = vadd.f32 %v1908_v13, %v1155_v9  ;;  %v1922_v18 = vadd.f32 %v1921_v14, %v1156_v10  ;;  %v4783_v13 = vld [vmem:[%s6453_s4 + $0x240] sm:$0xff] }
 0x703   : > { %3194 = vmatpush.bf16.msrb.mxu2 %v4781_v11  ;;  %3207 = vmatpush.bf16.msra.mxu3 %v4789_v12  ;;  %v4775_v12 = vld [vmem:[%s6453_s4 + $0x200] sm:$0xff] }
 0x704   : > { %v2035_v24 = vmax.f32 %v1909_v17, 0.0  ;;  %v2036_v25 = vmax.f32 %v1922_v18, 0.0  ;;  %v4822_v17 = vld [vmem:[%s6453_s4 + $0x378] sm:$0xff] }
 0x705   : > { %3222 = vmatpush.bf16.msrb.mxu0 %v4795_v15  ;;  %3235 = vmatpush.bf16.msra.mxu1 %v4803_v16  ;;  %v4814_v16 = vld [vmem:[%s6453_s4 + $0x338] sm:$0xff] }
 0x706   : > { %v2051_v28 = vpack.c.bf16 %v2035_v24, %v2035_v24  ;;  %v2052_v53 = vpack.c.bf16 %v2036_v25, %v2036_v25  ;;  %v1882_v30 = vpop.f32.mrf.mxu2  ;;  %v1895_v31 = vpop.f32.mrf.mxu3  ;;  %v4836_v24 = vld [vmem:[%s6453_s4 + $0x3e8] sm:$0xff] }
 0x707   : > { %3195 = vmatpush.bf16.msrb.mxu2 %v4780_v19  ;;  %3208 = vmatpush.bf16.msra.mxu3 %v4788_v20  ;;  %v1883_v29 = vadd.f32 %v1882_v30, %v1153_v21  ;;  %v1896_v32 = vadd.f32 %v1895_v31, %v1154_v23  ;;  %v4828_v23 = vld [vmem:[%s6453_s4 + $0x3a8] sm:$0xff]  ;;  %v4835_v30 = vld [vmem:[%s6453_s4 + $0x3e0] sm:$0xff] }
 0x708   : > { %3175 = vmatmul.bf16.vlgmr.msra.gmra.mxu0 %v2051_v28  ;;  %3188 = vmatmul.bf16.vlgmr.msrb.gmra.mxu1 %v2052_v53  ;;  %v4821_v28 = vld [vmem:[%s6453_s4 + $0x370] sm:$0xff]  ;;  %v4827_v53 = vld [vmem:[%s6453_s4 + $0x3a0] sm:$0xff] }
 0x709   : > { %v2033_v36 = vmax.f32 %v1883_v29, 0.0  ;;  %v2034_v37 = vmax.f32 %v1896_v32, 0.0  ;;  %3223 = vmatpush.bf16.msrb.mxu0 %v4794_v26  ;;  %3236 = vmatpush.bf16.msra.mxu1 %v4802_v27  ;;  %v1910_v38 = vpop.f32.mrf.mxu0  ;;  %v1923_v39 = vpop.f32.mrf.mxu1  ;;  %v4813_v27 = vld [vmem:[%s6453_s4 + $0x330] sm:$0xff]  ;;  %v4812_v32 = vld [vmem:[%s6453_s4 + $0x328] sm:$0xff] }
 0x70a   : > { %v4819_v38 = vld [vmem:[%s6453_s4 + $0x360] sm:$0xff]  ;;  %v4825_v39 = vld [vmem:[%s6453_s4 + $0x390] sm:$0xff] }
 0x70b   : > { %v2049_v42 = vpack.c.bf16 %v2033_v36, %v2033_v36  ;;  %v2050_v43 = vpack.c.bf16 %v2034_v37, %v2034_v37  ;;  %3196 = vmatpush.bf16.msrb.mxu2 %v4779_v33  ;;  %3209 = vmatpush.bf16.msra.mxu3 %v4787_v34  ;;  %v4820_v33 = vld [vmem:[%s6453_s4 + $0x368] sm:$0xff]  ;;  %v4826_v34 = vld [vmem:[%s6453_s4 + $0x398] sm:$0xff]  ;;  %v4811_v37 = vld [vmem:[%s6453_s4 + $0x320] sm:$0xff] }
 0x70c   : > { %v4834_v36 = vld [vmem:[%s6453_s4 + $0x3d8] sm:$0xff] }
 0x70d   : > { %3224 = vmatpush.bf16.msrb.mxu0 %v4793_v40  ;;  %3237 = vmatpush.bf16.msra.mxu1 %v4801_v41  ;;  %v4833_v40 = vld [vmem:[%s6453_s4 + $0x3d0] sm:$0xff]  ;;  %v4810_v41 = vld [vmem:[%s6453_s4 + $0x318] sm:$0xff] }
 0x70e   : > { %3149 = vmatmul.bf16.vlgmr.msra.gmra.mxu2 %v2049_v42  ;;  %3162 = vmatmul.bf16.vlgmr.msrb.gmra.mxu3 %v2050_v43  ;;  %v1884_v48 = vpop.f32.mrf.mxu2  ;;  %v1897_v49 = vpop.f32.mrf.mxu3  ;;  %v4818_v42 = vld [vmem:[%s6453_s4 + $0x358] sm:$0xff]  ;;  %v4824_v43 = vld [vmem:[%s6453_s4 + $0x388] sm:$0xff] }
 0x70f   : > { %3197 = vmatpush.bf16.msrb.mxu2 %v4778_v44  ;;  %3210 = vmatpush.bf16.msra.mxu3 %v4786_v45  ;;  %v4832_v44 = vld [vmem:[%s6453_s4 + $0x3c8] sm:$0xff]  ;;  %v1163_v45 = vperm.slane %v6299_v47, 6  ;;  %v4817_v48 = vld [vmem:[%s6453_s4 + $0x350] sm:$0xff]  ;;  %v4823_v49 = vld [vmem:[%s6453_s4 + $0x380] sm:$0xff] }
 0x711   : > { %3225 = vmatpush.bf16.msrb.mxu0 %v4792_v35  ;;  %3238 = vmatpush.bf16.msra.mxu1 %v4800_v46  ;;  %v1164_v35 = vperm.slane %v6299_v47, 7  ;;  %v4809_v46 = vld [vmem:[%s6453_s4 + $0x310] sm:$0xff] }
 0x713   : > { %3198 = vmatpush.bf16.msrb.mxu2 %v4777_v50  ;;  %3211 = vmatpush.bf16.msra.mxu3 %v4785_v51  ;;  %v4831_v50 = vld [vmem:[%s6453_s4 + $0x3c0] sm:$0xff] }
 0x714   : > { %v1960_v59 = vpop.f32.mrf.mxu0  ;;  %v1973_v60 = vpop.f32.mrf.mxu1 }
 0x715   : > { %v1961_v1 = vadd.f32 %v1960_v59, %v1159_v52  ;;  %v1974_v2 = vadd.f32 %v1973_v60, %v1160_v54  ;;  %3226 = vmatpush.bf16.msrb.mxu0 %v4791_v55  ;;  %3239 = vmatpush.bf16.msra.mxu1 %v4799_v56  ;;  %v4808_v56 = vld [vmem:[%s6453_s4 + $0x308] sm:$0xff]  ;;  %v1162_v59 = vperm.slane %v6299_v47, 5 }
 0x717   : > { %v2039_v4 = vmax.f32 %v1961_v1, 0.0  ;;  %v2040_v5 = vmax.f32 %v1974_v2, 0.0  ;;  %3199 = vmatpush.bf16.msrb.mxu2 %v4776_v63  ;;  %3212 = vmatpush.bf16.msra.mxu3 %v4784_v0  ;;  %v1934_v10 = vpop.f32.mrf.mxu2  ;;  %v1947_v11 = vpop.f32.mrf.mxu3 }
 0x718   : > { %v1935_v14 = vadd.f32 %v1934_v10, %v1157_v3  ;;  %v1948_v15 = vadd.f32 %v1947_v11, %v1158_v62  ;;  %v4807_v62 = vld [vmem:[%s6453_s4 + $0x300] sm:$0xff] }
 0x719   : > { %3271 = vmatpush.bf16.msra.mxu0 %v4830_v57  ;;  %3284 = vmatpush.bf16.msrb.mxu1 %v4838_v58  ;;  %v2055_v8 = vpack.c.bf16 %v2039_v4, %v2039_v4  ;;  %v2056_v9 = vpack.c.bf16 %v2040_v5, %v2040_v5  ;;  %v4816_v57 = vld [vmem:[%s6453_s4 + $0x348] sm:$0xff]  ;;  %v1161_v58 = vperm.slane %v6299_v47, 4  ;;  %v4815_v4 = vld [vmem:[%s6453_s4 + $0x340] sm:$0xff] }
 0x71a   : > { %v2037_v18 = vmax.f32 %v1935_v14, 0.0  ;;  %v2038_v19 = vmax.f32 %v1948_v15, 0.0 }
 0x71b   : > { %3227 = vmatmul.bf16.vlgmr.msrb.gmra.mxu0 %v2055_v8  ;;  %3240 = vmatmul.bf16.vlgmr.msra.gmra.mxu1 %v2056_v9 }
 0x71c   : > { %v1962_v20 = vpop.f32.mrf.mxu0  ;;  %v1975_v21 = vpop.f32.mrf.mxu1  ;;  %3200 = vmatpush.bf16.msrb.mxu2 %v4775_v12  ;;  %3213 = vmatpush.bf16.msra.mxu3 %v4783_v13  ;;  %v2053_v25 = vpack.c.bf16 %v2037_v18, %v2037_v18  ;;  %v2054_v26 = vpack.c.bf16 %v2038_v19, %v2038_v19 }
 0x71d   : > { %3272 = vmatpush.bf16.msra.mxu0 %v4829_v6  ;;  %3285 = vmatpush.bf16.msrb.mxu1 %v4837_v7 }
 0x71f   : > { %3201 = vmatmul.bf16.vlgmr.msrb.gmra.mxu2 %v2053_v25  ;;  %3214 = vmatmul.bf16.vlgmr.msra.gmra.mxu3 %v2054_v26  ;;  %v1936_v31 = vpop.f32.mrf.mxu2  ;;  %v1949_v29 = vpop.f32.mrf.mxu3 }
 0x720   : > { %3245 = vmatpush.bf16.msra.mxu2 %v4814_v16  ;;  %3258 = vmatpush.bf16.msrb.mxu3 %v4822_v17 }
 0x721   : > { %3273 = vmatpush.bf16.msra.mxu0 %v4828_v23  ;;  %3286 = vmatpush.bf16.msrb.mxu1 %v4836_v24 }
 0x724   : > { %3246 = vmatpush.bf16.msra.mxu2 %v4813_v27  ;;  %3259 = vmatpush.bf16.msrb.mxu3 %v4821_v28 }
 0x725   : > { %3274 = vmatpush.bf16.msra.mxu0 %v4827_v53  ;;  %3287 = vmatpush.bf16.msrb.mxu1 %v4835_v30  ;;  %v4854_v53 = vld [vmem:[%s6457_s8] ss:$0 sm:$0xff] }
 0x728   : > { %3247 = vmatpush.bf16.msra.mxu2 %v4812_v32  ;;  %3260 = vmatpush.bf16.msrb.mxu3 %v4820_v33 }
 0x729   : > { %3275 = vmatpush.bf16.msra.mxu0 %v4826_v34  ;;  %3288 = vmatpush.bf16.msrb.mxu1 %v4834_v36 }
 0x72c   : > { %3248 = vmatpush.bf16.msra.mxu2 %v4811_v37  ;;  %3261 = vmatpush.bf16.msrb.mxu3 %v4819_v38 }
 0x72d   : > { %3276 = vmatpush.bf16.msra.mxu0 %v4825_v39  ;;  %3289 = vmatpush.bf16.msrb.mxu1 %v4833_v40 }
 0x730   : > { %3249 = vmatpush.bf16.msra.mxu2 %v4810_v41  ;;  %3262 = vmatpush.bf16.msrb.mxu3 %v4818_v42 }
 0x731   : > { %3277 = vmatpush.bf16.msra.mxu0 %v4824_v43  ;;  %3290 = vmatpush.bf16.msrb.mxu1 %v4832_v44 }
 0x732   : > { %v2012_v51 = vpop.f32.mrf.mxu0  ;;  %v2025_v52 = vpop.f32.mrf.mxu1 }
 0x733   : > { %v2013_v54 = vadd.f32 %v2012_v51, %v1163_v45  ;;  %v2026_v55 = vadd.f32 %v2025_v52, %v1164_v35 }
 0x734   : > { %3250 = vmatpush.bf16.msra.mxu2 %v4809_v46  ;;  %3263 = vmatpush.bf16.msrb.mxu3 %v4817_v48 }
 0x735   : > { %v2043_v60 = vmax.f32 %v2013_v54, 0.0  ;;  %v2044_v63 = vmax.f32 %v2026_v55, 0.0  ;;  %3278 = vmatpush.bf16.msra.mxu0 %v4823_v49  ;;  %3291 = vmatpush.bf16.msrb.mxu1 %v4831_v50 }
 0x737   : > { %v2059_v0 = vpack.c.bf16 %v2043_v60, %v2043_v60  ;;  %v2060_v1 = vpack.c.bf16 %v2044_v63, %v2044_v63  ;;  %v1986_v2 = vpop.f32.mrf.mxu2  ;;  %v1999_v3 = vpop.f32.mrf.mxu3 }
 0x738   : > { %3251 = vmatpush.bf16.msra.mxu2 %v4808_v56  ;;  %3264 = vmatpush.bf16.msrb.mxu3 %v4816_v57  ;;  %v1987_v5 = vadd.f32 %v1986_v2, %v1161_v58  ;;  %v2000_v47 = vadd.f32 %v1999_v3, %v1162_v59 }
 0x739   : > { %3279 = vmatmul.bf16.vlgmr.msra.gmra.mxu0 %v2059_v0  ;;  %3292 = vmatmul.bf16.vlgmr.msrb.gmra.mxu1 %v2060_v1 }
 0x73a   : > { %v2041_v6 = vmax.f32 %v1987_v5, 0.0  ;;  %v2042_v7 = vmax.f32 %v2000_v47, 0.0  ;;  %v2014_v8 = vpop.f32.mrf.mxu0  ;;  %v2027_v9 = vpop.f32.mrf.mxu1 }
 0x73c   : > { %3252 = vmatpush.bf16.msra.mxu2 %v4807_v62  ;;  %3265 = vmatpush.bf16.msrb.mxu3 %v4815_v4  ;;  %v2057_v10 = vpack.c.bf16 %v2041_v6, %v2041_v6  ;;  %v2058_v11 = vpack.c.bf16 %v2042_v7, %v2042_v7 }
 0x73f   : > { %3253 = vmatmul.bf16.vlgmr.msra.gmra.mxu2 %v2057_v10  ;;  %3266 = vmatmul.bf16.vlgmr.msrb.gmra.mxu3 %v2058_v11  ;;  %v1988_v12 = vpop.f32.mrf.mxu2  ;;  %v2001_v13 = vpop.f32.mrf.mxu3 }
 0x775   : > { %v3124_v14 = vpop.f32.mrf.mxu0  ;;  %v3137_v15 = vpop.f32.mrf.mxu1 }
 0x77d   : > { %v3126_v16 = vpop.f32.mrf.mxu0  ;;  %v3139_v17 = vpop.f32.mrf.mxu1 }
 0x781   : > { %v3098_v18 = vpop.f32.mrf.mxu2  ;;  %v3111_v19 = vpop.f32.mrf.mxu3 }
 0x782   : > { %v3099_v30 = vadd.f32 %v4854_v53, %v3098_v18 }
 0x784   : > { %v3112_v34 = vadd.f32 %v3111_v19, %v3099_v30 }
 0x785   : > { %v3176_v20 = vpop.f32.mrf.mxu0  ;;  %v3189_v21 = vpop.f32.mrf.mxu1 }
 0x786   : > { %v3125_v36 = vadd.f32 %v3124_v14, %v3112_v34  ;;  %v4855_v14 = vld [vmem:[%s6460_s11] ss:$0 sm:$0xff] }
 0x788   : > { %v3138_v39 = vadd.f32 %v3137_v15, %v3125_v36 }
 0x789   : > { %v3100_v23 = vpop.f32.mrf.mxu2  ;;  %v3113_v24 = vpop.f32.mrf.mxu3 }
 0x78d   : > { %v3178_v25 = vpop.f32.mrf.mxu0  ;;  %v3191_v26 = vpop.f32.mrf.mxu1 }
 0x791   : > { %v3150_v27 = vpop.f32.mrf.mxu2  ;;  %v3163_v28 = vpop.f32.mrf.mxu3 }
 0x792   : > { %v3151_v42 = vadd.f32 %v3150_v27, %v3138_v39 }
 0x794   : > { %v3164_v43 = vadd.f32 %v3163_v28, %v3151_v42 }
 0x796   : > { %v3177_v35 = vadd.f32 %v3176_v20, %v3164_v43 }
 0x798   : > { %v3228_v31 = vpop.f32.mrf.mxu0  ;;  %v3241_v29 = vpop.f32.mrf.mxu1  ;;  %v3190_v46 = vadd.f32 %v3189_v21, %v3177_v35 }
 0x799   : > { %v3152_v32 = vpop.f32.mrf.mxu2  ;;  %v3165_v33 = vpop.f32.mrf.mxu3 }
 0x7a0   : > { %v3230_v37 = vpop.f32.mrf.mxu0  ;;  %v3243_v38 = vpop.f32.mrf.mxu1 }
 0x7a2   : > { %v3202_v40 = vpop.f32.mrf.mxu2  ;;  %v3215_v41 = vpop.f32.mrf.mxu3 }
 0x7a3   : > { %v3203_v48 = vadd.f32 %v3202_v40, %v3190_v46 }
 0x7a5   : > { %v3216_v51 = vadd.f32 %v3215_v41, %v3203_v48 }
 0x7a7   : > { %v3229_v52 = vadd.f32 %v3228_v31, %v3216_v51 }
 0x7a9   : > { %v3242_v56 = vadd.f32 %v3241_v29, %v3229_v52 }
 0x7aa   : > { %v3204_v44 = vpop.f32.mrf.mxu2  ;;  %v3217_v45 = vpop.f32.mrf.mxu3 }
 0x7b6   : > { %v3280_v49 = vpop.f32.mrf.mxu0  ;;  %v3293_v50 = vpop.f32.mrf.mxu1 }
 0x7be   : > { %v3282_v54 = vpop.f32.mrf.mxu0  ;;  %v3295_v55 = vpop.f32.mrf.mxu1 }
 0x7c2   : > { %v3254_v57 = vpop.f32.mrf.mxu2  ;;  %v3267_v58 = vpop.f32.mrf.mxu3 }
 0x7c3   : > { %v3255_v59 = vadd.f32 %v3254_v57, %v3242_v56 }
 0x7c5   : > { %v3268_v60 = vadd.f32 %v3267_v58, %v3255_v59 }
 0x7c7   : > { %v3281_v63 = vadd.f32 %v3280_v49, %v3268_v60 }
 0x7c9   : > { %v3294_v0 = vadd.f32 %v3293_v50, %v3281_v63 }
 0x7ca   : > { %v3256_v1 = vpop.f32.mrf.mxu2  ;;  %v3269_v2 = vpop.f32.mrf.mxu3 }
 0x7cb   : > { %v3297_v3 = vadd.f32 %v3294_v0, %v5628_v61 }
 0x7cd   : > { %3300 = vadd.xlane.f32.xlu1 %v3297_v3 }
 0x840   : > { %v3301_v62 = vpop.xlane.xlu1 %3300 }
 0x841   : > { %v3302_v4 = vmul.f32 %v3301_v62, %v5381_v22 }
 0x843   : > { %v3303_v5 = vsub.f32 %v3297_v3, %v3302_v4 }
 0x845   : > { %v3304_v47 = vmul.f32 %v3303_v5, %v3303_v5 }
 0x847   : > { %3305 = vadd.xlane.f32.xlu2 %v3304_v47 }
 0x8ba   : > { %v3306_v6 = vpop.xlane.xlu2 %3305 }
 0x8bb   : > { %v3307_v7 = vmul.f32 %v3306_v6, %v5381_v22  ;;  %v4856_v22 = vld [vmem:[%s6461_s12] ss:$0 sm:$0xff] }
 0x8bd   : > { %v3308_v8 = vadd.f32 1e-05, %v3307_v7 }
 0x8bf   : > { %4877 = vrsqrt.f32 %v3308_v8  ;;  %vm3315_vm10 = vweird.f32 %v3308_v8 }
 0x8c5   : > { %v4878_v9 = vpop.eup %4877 }
 0x8c6   : > { %v3310_v10 = vmul.f32 %v4878_v9, %v3308_v8  ;;  %vm3316_vm9 = vweird.f32 %v4878_v9 }
 0x8c7   : > { %vm3317_vm11 = vmor %vm3315_vm10, %vm3316_vm9 }
 0x8c8   : > { %v3311_v11 = vmul.f32 %v4878_v9, %v3310_v10 }
 0x8ca   : > { %v3312_v12 = vmul.f32 0.5, %v3311_v11 }
 0x8cc   : > { %v3313_v13 = vsub.f32 1.5, %v3312_v12 }
 0x8ce   : > { %v3314_v61 = vmul.f32 %v4878_v9, %v3313_v13 }
 0x8d0   : > { %v3318_v15 = vsel %vm3317_vm11, %v4878_v9, %v3314_v61 }
 0x8d1   : > { %v3319_v16 = vmul.f32 %v3318_v15, %v3303_v5 }
 0x8d3   : > { %v3323_v17 = vmul.f32 %v4855_v14, %v3319_v16 }
 0x8d5   : > { %v3327_v18 = vadd.f32 %v4856_v22, %v3323_v17 }
 0x8d7   : > { %3328 = vst [vmem:[%s435_s16] sm:$0xff] %v3327_v18 }
 0x8d8 PF: > { %s23_s25 = sadd.s32 1, %s4885_s25  }
 0x8d9   : > { %p20_p4 = scmp.ge.s32.totalorder %s23_s25, 4  }
 0x8db   :  { %22 = sbr.rel (!%p20_p4) target bundleno = 1 (0x1), region = 102 }

</bundles_post_ra>
